<compile_context>
chip_gen: v7x
topology: tpu7x:2x2x1
jax: 0.10.0
libtpu: 0.0.40
codegen_flags: <defaults>
</compile_context>

<pallas_src>
import functools

import jax
import jax.numpy as jnp
from jax.experimental import pallas as pl
from jax.experimental.pallas import tpu as pltpu


# -----------------------------------------------------------------------------
# Exact GELU built from guaranteed-lowerable ops (exp / mul / add / max).
# erf via Abramowitz & Stegun 7.1.26 (|abs err| <= 1.5e-7), folded as
#   gelu(x) = relu(x) - 0.5*|x| * P(t) * exp(-z^2),  z = |x|/sqrt(2),
# which is algebraically identical to 0.5*x*(1+erf(x/sqrt(2))) for both signs
# and avoids the where()/sign handling entirely.
# -----------------------------------------------------------------------------
_SQRT_HALF = 0.7071067811865476
_P = 0.3275911
_A1, _A2, _A3, _A4, _A5 = (0.254829592, -0.284496736, 1.421413741,
                           -1.453152027, 1.061405429)


def _gelu_exact(x):
    ax = jnp.abs(x)
    z = ax * _SQRT_HALF
    t = 1.0 / (1.0 + _P * z)          # exact divide: keeps 1e-4 parity check safe
    poly = ((((_A5 * t + _A4) * t + _A3) * t + _A2) * t + _A1) * t
    return jnp.maximum(x, 0.0) - (0.5 * ax) * (poly * jnp.exp(-(z * z)))


# -----------------------------------------------------------------------------
# Fused kernel: (1x1 conv -> GELU -> 1x1 conv) on one (batch, spatial-tile)
# block.  Layout: channels on sublanes / matmul rows, spatial on lanes.
# -----------------------------------------------------------------------------
def _make_ffn_kernel(use_bf16_matmul):
    def kernel(x_ref, w1_ref, b1_ref, w2_ref, b2_ref, o_ref):
        # x_ref : (C, tS)   input channels x spatial tile (batch dim squeezed)
        # w1_ref: (Hd, C)   first 1x1 conv weight (out, in)   [bf16 if flagged]
        # b1_ref: (Hd, 1)
        # w2_ref: (C, Hd)   second 1x1 conv weight (out, in)  [bf16 if flagged]
        # b2_ref: (C, 1)
        # o_ref : (C, tS)
        x = x_ref[...]
        if use_bf16_matmul:
            x = x.astype(jnp.bfloat16)
        h = jnp.dot(w1_ref[...], x, preferred_element_type=jnp.float32)
        h = _gelu_exact(h + b1_ref[...])                 # (Hd, tS), f32
        # TODO(synk): Dropout omitted (eval-mode identity); no RNG dropout in-kernel.
        if use_bf16_matmul:
            h = h.astype(jnp.bfloat16)
        y = jnp.dot(w2_ref[...], h, preferred_element_type=jnp.float32)
        o_ref[...] = (y + b2_ref[...]).astype(o_ref.dtype)
    return kernel


# -----------------------------------------------------------------------------
# Helpers
# -----------------------------------------------------------------------------
def _round_up(x, m):
    return (x + m - 1) // m * m


def _cdiv(a, b):
    return (a + b - 1) // b


def _wn_fold(v, g):
    # PyTorch weight_norm, dim=0: per-output-channel norm over remaining dims.
    norm = jnp.sqrt(jnp.sum(v * v, axis=tuple(range(1, v.ndim)), keepdims=True))
    return v * (g.reshape((-1,) + (1,) * (v.ndim - 1)) / norm)


def _choose_spatial_tile(S, B, max_tile):
    """Pick a 128-aligned spatial tile with <=127 lanes of waste and >=2 grid blocks."""
    S128 = _round_up(S, 128)
    n = _cdiv(S128, max_tile)                       # balanced number of tiles
    tS = _round_up(_cdiv(S128, n), 128)
    # v7x megacore: make sure the (parallel x parallel) grid has >= 2 programs
    # so the second TensorCore is not idle.  v5e/v6e (1 TC) unaffected.
    if B * _cdiv(S128, tS) < 2 and S128 >= 256:
        tS = _round_up(_cdiv(S128, 2), 128)
    if tS >= S:
        tS = S                                      # full-extent block (always legal)
    return tS


def _vmem_budget_bytes(C, Hd, tS):
    f32 = 4
    io = 2 * (2 * C * tS * f32)                     # in + out blocks, double-buffered
    w = 2 * (Hd * C + C * Hd + Hd + C) * f32        # resident weights/biases (x2 buf)
    tmp = 8 * Hd * tS * f32                         # conservative live GELU temporaries
    budget = io + w + tmp + (4 << 20)               # headroom
    # Lower clamp = v5e scoped default; upper clamp keeps headroom on v7x (64 MiB phys).
    return min(max(budget, 16 << 20), 48 << 20)


# -----------------------------------------------------------------------------
# Wrapper
# -----------------------------------------------------------------------------
def feedforward_forward(x_nchw, params, *, max_tile=4096, use_bf16_matmul=False):
    """x_nchw: (B, dim, H, W)  ->  (B, dim, H, W)."""
    B, C, H, W = x_nchw.shape

    # Fold weight_norm into effective (out, in) matrices (tiny, plain JAX).
    w1 = _wn_fold(params["w1_v"], params["w1_g"])[:, :, 0, 0]   # (Hd, C)
    w2 = _wn_fold(params["w2_v"], params["w2_g"])[:, :, 0, 0]   # (C, Hd)
    b1 = params["b1"].reshape(-1, 1)                            # (Hd, 1)
    b2 = params["b2"].reshape(-1, 1)                            # (C, 1)
    Hd = w1.shape[0]
    if use_bf16_matmul:
        # MXU-native operands; breaks strict 1e-4 parity vs. f32 reference.
        w1 = w1.astype(jnp.bfloat16)
        w2 = w2.astype(jnp.bfloat16)

    # Flatten spatial -> lanes.  No host-side pad: the grid covers the ragged
    # tail, Pallas masks the out-of-range portion of the last block's store.
    S = H * W
    x_r = x_nchw.reshape(B, C, S)
    tS = _choose_spatial_tile(S, B, max_tile)
    num_s = _cdiv(S, tS)

    cost = pl.CostEstimate(
        flops=4 * B * S * C * Hd,                  # two matmuls, 2*M*N*K each
        transcendentals=B * S * Hd,                # one exp per hidden element
        bytes_accessed=(2 * B * C * S + 2 * C * Hd + Hd + C) * 4,
    )

    out = pl.pallas_call(
        _make_ffn_kernel(use_bf16_matmul),
        out_shape=jax.ShapeDtypeStruct((B, C, S), x_nchw.dtype),
        grid_spec=pltpu.PrefetchScalarGridSpec(
            num_scalar_prefetch=0,
            grid=(B, num_s),
            in_specs=[
                pl.BlockSpec((None, C, tS), lambda b, j: (b, 0, j)),
                pl.BlockSpec((Hd, C), lambda b, j: (0, 0)),
                pl.BlockSpec((Hd, 1), lambda b, j: (0, 0)),
                pl.BlockSpec((C, Hd), lambda b, j: (0, 0)),
                pl.BlockSpec((C, 1), lambda b, j: (0, 0)),
            ],
            out_specs=pl.BlockSpec((None, C, tS), lambda b, j: (b, 0, j)),
        ),
        compiler_params=pltpu.CompilerParams(
            dimension_semantics=("parallel", "parallel"),
            vmem_limit_bytes=_vmem_budget_bytes(C, Hd, tS)),
        cost_estimate=cost,
    )(x_r, w1, b1, w2, b2)

    return out.reshape(B, C, H, W)


# -----------------------------------------------------------------------------
# Pure-JAX reference (real 1x1 convs + exact GELU) for correctness check.
# -----------------------------------------------------------------------------
def reference_forward(x, params):
    w1 = _wn_fold(params["w1_v"], params["w1_g"])
    w2 = _wn_fold(params["w2_v"], params["w2_g"])
    h = jax.lax.conv_general_dilated(
        x, w1, window_strides=(1, 1), padding="VALID",
        dimension_numbers=("NCHW", "OIHW", "NCHW"))
    h = h + params["b1"][None, :, None, None]
    h = jax.nn.gelu(h, approximate=False)
    y = jax.lax.conv_general_dilated(
        h, w2, window_strides=(1, 1), padding="VALID",
        dimension_numbers=("NCHW", "OIHW", "NCHW"))
    return y + params["b2"][None, :, None, None]


if __name__ == "__main__":
    # Small shapes consistent with the module: dim=32, mult=4, 16x16 image, B=2.
    B, dim, H, W = 2, 32, 16, 16
    mult = 4
    hidden = dim * mult

    key = jax.random.PRNGKey(0)
    ks = jax.random.split(key, 7)
    params = {
        "w1_v": jax.random.normal(ks[0], (hidden, dim, 1, 1), jnp.float32) * 0.1,
        "w1_g": jax.random.uniform(ks[1], (hidden,), jnp.float32, 0.5, 1.5),
        "b1":   jax.random.normal(ks[2], (hidden,), jnp.float32) * 0.1,
        "w2_v": jax.random.normal(ks[3], (dim, hidden, 1, 1), jnp.float32) * 0.1,
        "w2_g": jax.random.uniform(ks[4], (dim,), jnp.float32, 0.5, 1.5),
        "b2":   jax.random.normal(ks[5], (dim,), jnp.float32) * 0.1,
    }
    x = jax.random.normal(ks[6], (B, dim, H, W), jnp.float32)

    out = jax.block_until_ready(feedforward_forward(x, params))
    ref = jax.block_until_ready(reference_forward(x, params))

    assert out.shape == (B, dim, H, W)
    assert jnp.allclose(out, ref, atol=1e-4, rtol=1e-4), (
        "mismatch vs reference: max abs err = "
        f"{float(jnp.max(jnp.abs(out - ref)))}")

    print("KERNEL_OK")
</pallas_src>

<mosaic_0001>
module attributes {stable_mosaic.version = 11 : i64} {
  func.func @kernel(%arg0: i32, %arg1: i32, %arg2: memref<1x32x256xf32, #tpu.memory_space<vmem>>, %arg3: memref<128x32xf32, #tpu.memory_space<vmem>>, %arg4: memref<128x1xf32, #tpu.memory_space<vmem>>, %arg5: memref<32x128xf32, #tpu.memory_space<vmem>>, %arg6: memref<32x1xf32, #tpu.memory_space<vmem>>, %arg7: memref<1x32x256xf32, #tpu.memory_space<vmem>>) attributes {dimension_semantics = [#tpu.dimension_semantics<parallel>, #tpu.dimension_semantics<parallel>], iteration_bounds = array<i64: 2, 1>, scalar_prefetch = 0 : i64, scratch_operands = 0 : i64, tpu.core_type = #tpu.core_type<tc>, window_params = [{transform_indices = @transform_0, window_bounds = array<i64: 1, 32, 256>}, {pipeline_mode = #tpu.pipeline_mode<synchronous>, transform_indices = @transform_1, window_bounds = array<i64: 128, 32>}, {pipeline_mode = #tpu.pipeline_mode<synchronous>, transform_indices = @transform_2, window_bounds = array<i64: 128, 1>}, {pipeline_mode = #tpu.pipeline_mode<synchronous>, transform_indices = @transform_3, window_bounds = array<i64: 32, 128>}, {pipeline_mode = #tpu.pipeline_mode<synchronous>, transform_indices = @transform_4, window_bounds = array<i64: 32, 1>}, {transform_indices = @transform_5, window_bounds = array<i64: 1, 32, 256>}]} {
    %c0 = arith.constant 0 : index
    %c0_0 = arith.constant 0 : index
    %c0_1 = arith.constant 0 : index
    %0 = vector.load %arg2[%c0, %c0_0, %c0_1] : memref<1x32x256xf32, #tpu.memory_space<vmem>>, vector<1x32x256xf32>
    %1 = vector.shape_cast %0 : vector<1x32x256xf32> to vector<32x256xf32>
    %c0_2 = arith.constant 0 : index
    %c0_3 = arith.constant 0 : index
    %2 = vector.load %arg3[%c0_2, %c0_3] : memref<128x32xf32, #tpu.memory_space<vmem>>, vector<128x32xf32>
    %cst = arith.constant dense<0.000000e+00> : vector<128x256xf32>
    %3 = tpu.matmul %2, %1, %cst {dimension_numbers = #tpu.dot_dimension_numbers<[1], [0], [0], [1], [0, 0, 1, 1], [], []>} : vector<128x32xf32>, vector<32x256xf32>, vector<128x256xf32> -> vector<128x256xf32>
    %c0_4 = arith.constant 0 : index
    %c0_5 = arith.constant 0 : index
    %4 = vector.load %arg4[%c0_4, %c0_5] : memref<128x1xf32, #tpu.memory_space<vmem>>, vector<128x1xf32>
    %5 = vector.broadcast %4 : vector<128x1xf32> to vector<128x256xf32>
    %6 = arith.addf %3, %5 : vector<128x256xf32>
    %7 = math.absf %6 : vector<128x256xf32>
    %cst_6 = arith.constant 0.707106769 : f32
    %8 = vector.broadcast %cst_6 : f32 to vector<128x256xf32>
    %9 = arith.mulf %7, %8 : vector<128x256xf32>
    %cst_7 = arith.constant 0.327591091 : f32
    %10 = vector.broadcast %cst_7 : f32 to vector<128x256xf32>
    %11 = arith.mulf %10, %9 : vector<128x256xf32>
    %cst_8 = arith.constant 1.000000e+00 : f32
    %12 = vector.broadcast %cst_8 : f32 to vector<128x256xf32>
    %13 = arith.addf %12, %11 : vector<128x256xf32>
    %cst_9 = arith.constant 1.000000e+00 : f32
    %14 = vector.broadcast %cst_9 : f32 to vector<128x256xf32>
    %15 = arith.divf %14, %13 : vector<128x256xf32>
    %cst_10 = arith.constant 1.06140542 : f32
    %16 = vector.broadcast %cst_10 : f32 to vector<128x256xf32>
    %17 = arith.mulf %16, %15 : vector<128x256xf32>
    %cst_11 = arith.constant -1.45315206 : f32
    %18 = vector.broadcast %cst_11 : f32 to vector<128x256xf32>
    %19 = arith.addf %17, %18 : vector<128x256xf32>
    %20 = arith.mulf %19, %15 : vector<128x256xf32>
    %cst_12 = arith.constant 1.42141378 : f32
    %21 = vector.broadcast %cst_12 : f32 to vector<128x256xf32>
    %22 = arith.addf %20, %21 : vector<128x256xf32>
    %23 = arith.mulf %22, %15 : vector<128x256xf32>
    %cst_13 = arith.constant -0.284496725 : f32
    %24 = vector.broadcast %cst_13 : f32 to vector<128x256xf32>
    %25 = arith.addf %23, %24 : vector<128x256xf32>
    %26 = arith.mulf %25, %15 : vector<128x256xf32>
    %cst_14 = arith.constant 0.254829586 : f32
    %27 = vector.broadcast %cst_14 : f32 to vector<128x256xf32>
    %28 = arith.addf %26, %27 : vector<128x256xf32>
    %29 = arith.mulf %28, %15 : vector<128x256xf32>
    %cst_15 = arith.constant 0.000000e+00 : f32
    %30 = vector.broadcast %cst_15 : f32 to vector<128x256xf32>
    %31 = arith.maximumf %6, %30 : vector<128x256xf32>
    %cst_16 = arith.constant 5.000000e-01 : f32
    %32 = vector.broadcast %cst_16 : f32 to vector<128x256xf32>
    %33 = arith.mulf %32, %7 : vector<128x256xf32>
    %34 = arith.mulf %9, %9 : vector<128x256xf32>
    %cst_17 = arith.constant 0.000000e+00 : f32
    %35 = vector.broadcast %cst_17 : f32 to vector<128x256xf32>
    %36 = arith.subf %35, %34 : vector<128x256xf32>
    %37 = math.exp %36 : vector<128x256xf32>
    %38 = arith.mulf %29, %37 : vector<128x256xf32>
    %39 = arith.mulf %33, %38 : vector<128x256xf32>
    %40 = arith.subf %31, %39 : vector<128x256xf32>
    %c0_18 = arith.constant 0 : index
    %c0_19 = arith.constant 0 : index
    %41 = vector.load %arg5[%c0_18, %c0_19] : memref<32x128xf32, #tpu.memory_space<vmem>>, vector<32x128xf32>
    %cst_20 = arith.constant dense<0.000000e+00> : vector<32x256xf32>
    %42 = tpu.matmul %41, %40, %cst_20 {dimension_numbers = #tpu.dot_dimension_numbers<[1], [0], [0], [1], [0, 0, 1, 1], [], []>} : vector<32x128xf32>, vector<128x256xf32>, vector<32x256xf32> -> vector<32x256xf32>
    %c0_21 = arith.constant 0 : index
    %c0_22 = arith.constant 0 : index
    %43 = vector.load %arg6[%c0_21, %c0_22] : memref<32x1xf32, #tpu.memory_space<vmem>>, vector<32x1xf32>
    %44 = vector.broadcast %43 : vector<32x1xf32> to vector<32x256xf32>
    %45 = arith.addf %42, %44 : vector<32x256xf32>
    %c0_23 = arith.constant 0 : index
    %c0_24 = arith.constant 0 : index
    %c0_25 = arith.constant 0 : index
    %46 = vector.load %arg7[%c0_23, %c0_24, %c0_25] : memref<1x32x256xf32, #tpu.memory_space<vmem>>, vector<1x32x256xf32>
    %47 = vector.shape_cast %46 : vector<1x32x256xf32> to vector<32x256xf32>
    %48 = vector.shape_cast %45 : vector<32x256xf32> to vector<1x32x256xf32>
    tpu.vector_store %arg7[%c0_23, %c0_24, %c0_25], %48 {strides = array<i32>} : memref<1x32x256xf32, #tpu.memory_space<vmem>>, vector<1x32x256xf32>,
    return
  }
  func.func @transform_0(%arg0: i32, %arg1: i32) -> (i32, i32, i32) {
    %c0_i32 = arith.constant 0 : i32
    %c0_i32_0 = arith.constant 0 : i32
    return %arg0, %c0_i32, %arg1 : i32, i32, i32
  }
  func.func @transform_1(%arg0: i32, %arg1: i32) -> (i32, i32) {
    %c0_i32 = arith.constant 0 : i32
    %c0_i32_0 = arith.constant 0 : i32
    %c0_i32_1 = arith.constant 0 : i32
    return %c0_i32, %c0_i32_0 : i32, i32
  }
  func.func @transform_2(%arg0: i32, %arg1: i32) -> (i32, i32) {
    %c0_i32 = arith.constant 0 : i32
    %c0_i32_0 = arith.constant 0 : i32
    %c0_i32_1 = arith.constant 0 : i32
    return %c0_i32, %c0_i32_0 : i32, i32
  }
  func.func @transform_3(%arg0: i32, %arg1: i32) -> (i32, i32) {
    %c0_i32 = arith.constant 0 : i32
    %c0_i32_0 = arith.constant 0 : i32
    %c0_i32_1 = arith.constant 0 : i32
    return %c0_i32, %c0_i32_0 : i32, i32
  }
  func.func @transform_4(%arg0: i32, %arg1: i32) -> (i32, i32) {
    %c0_i32 = arith.constant 0 : i32
    %c0_i32_0 = arith.constant 0 : i32
    %c0_i32_1 = arith.constant 0 : i32
    return %c0_i32, %c0_i32_0 : i32, i32
  }
  func.func @transform_5(%arg0: i32, %arg1: i32) -> (i32, i32, i32) {
    %c0_i32 = arith.constant 0 : i32
    %c0_i32_0 = arith.constant 0 : i32
    return %arg0, %c0_i32, %arg1 : i32, i32, i32
  }
}

</mosaic_0001>

<bundles_post_ra>
// kernel: tpu_custom_call.1
= control target key start
LH: loop header
LB: loop body
LE: loop exit
PB: predicated region body
PF: predicated region fallthrough
CT: control target
= control target key end

     0   :  { %10 = vsyncpa [#allocation3], 0  ;;  %s2956_s0 = inlined_call_operand.vmem [shape: f32[2,32,256], index: 0, kind: input, shape index: {}]   ;;  %s2957_s1 = inlined_call_operand.vmem [shape: f32[128,32], index: 1, kind: input, shape index: {}]   ;;  %s2958_s2 = inlined_call_operand.vmem [shape: f32[128,1], index: 2, kind: input, shape index: {}]   ;;  %s2959_s3 = inlined_call_operand.vmem [shape: f32[32,128], index: 3, kind: input, shape index: {}]   ;;  %s2960_s4 = inlined_call_operand.vmem [shape: f32[32,1], index: 4, kind: input, shape index: {}]   ;;  %s2961_s5 = inlined_call_operand.hbm [shape: f32[2,32,256], index: 5, kind: output, shape index: {}]  }
   0x1   :  { %12 = vsyncpa [#allocation3 + $0x1], 0  ;;  %s1947_s18 = smov 0   ;;  %s1949_s19 = smov 0  }
   0x2   :  { %s1951_s20 = smov 0   ;;  %s1953_s21 = smov 0  }
   0x3   :  { %s1955_s22 = smov 0   ;;  %s1957_s23 = smov 0  }
   0x4 LB: > { %s1572_s24 = sadd.s32 4294967295, %s1910_s23   ;;  %s1573_s25 = sadd.s32 4294967294, %s1910_s23   ;;  %s1910_s23 = sphi %s1957_s23, %s18_s23   ;;  %s1906_s22 = sphi %s1955_s22, %s3085_s22   ;;  %s1902_s21 = sphi %s1953_s21, %s3084_s21   ;;  %s1898_s20 = sphi %s1951_s20, %s3083_s20   ;;  %s1894_s19 = sphi %s1949_s19, %s3082_s19   ;;  %s1890_s18 = sphi %s1947_s18, %s3081_s18  }
   0x5   : > { %s30_s26 = sadd.s32 1, %s1906_s22  ;;  %s151_s27 = sadd.s32 1, %s1898_s20 }
   0x6   : > { %p32_p0 = scmp.ge.s32.totalorder %s30_s26, 2  ;;  %p161_p1 = scmp.ne.s32.totalorder %s1898_s20, %s1894_s19 }
   0x7   : > { %p162_p2 = scmp.eq.s32.totalorder %s1572_s24, 1  ;;  %p167_p3 = scmp.ne.s32.totalorder %s1894_s19, %s1890_s18 }
   0x8   : > { %s3087_s26 = smov (%p32_p0, %s30_s26), 0  ;;  %p168_p5 = scmp.eq.s32.totalorder %s1573_s25, 1 }
   0x9   : > { %p1987_p4 = por %p162_p2, %p161_p1  ;;  %s146_s29 = ssub.s32 %s1906_s22, %s3087_s26 }
   0xa   : > { %p1576_p6 = scmp.ge.s32.totalorder %s1910_s23, 1  ;;  %p149_p7 = scmp.eq.s32.totalorder %s146_s29, 0 }
   0xb   : > { %p1994_p8 = por %p168_p5, %p167_p3  ;;  %p211_p9 = scmp.lt.s32.totalorder %s1910_s23, 3 }
   0xc   : > { %s2000_s6 = scalar_select %p149_p7, %s1898_s20, %s151_s27  }
   0xd   : > { %p212_p10 = pnand %p1576_p6, %p211_p9 }
   0xf   : > { %215 = sbr.rel (%p212_p10) target bundleno = 722 (0x2d2), region = 40 }
  0x16   : > { %p244_p11 = scmp.lt.s32.totalorder %s1902_s21, 1  ;;  %v2962_v0 = vmov 0.0   ;;  %v1913_v1 = vmov 0   ;;  %v278_v2 = vld [vmem:[%s2958_s2] sm:$0xff]  ;;  %v280_v3 = vld [vmem:[%s2958_s2 + $0x10] sm:$0xff]  ;;  %v279_v15 = vld [vmem:[%s2958_s2 + $0x8] sm:$0xff] }
  0x17   : > { %487 = vmatprep.mubr.f32.mxu0 %v2962_v0  ;;  %1444 = vmatprep.mubr.f32.mxu1 %v2962_v0  ;;  %v281_v16 = vld [vmem:[%s2958_s2 + $0x18] sm:$0xff]  ;;  %v282_v18 = vld [vmem:[%s2958_s2 + $0x20] sm:$0xff]  ;;  %v283_v19 = vld [vmem:[%s2958_s2 + $0x28] sm:$0xff]  ;;  %vm374_vm0 = vcmask 261120   ;;  %s240_s17 = sand.u32 1, %s1894_s19   ;;  %s1602_s27 = sshll.u32 %s1902_s21, 10 }
  0x18   : > { %s245_s7 = scalar_select %p244_p11, %s1902_s21, 1  ;;  %1702 = vset.pattern.permute.xlu0 %v1913_v1  ;;  %1703 = vset.pattern.permute.xlu1 %v1913_v1  ;;  %v262_v20 = vld [vmem:[%s2957_s1] sm:$0xff]  ;;  %v284_v21 = vld [vmem:[%s2958_s2 + $0x30] sm:$0xff]  ;;  %v285_v22 = vld [vmem:[%s2958_s2 + $0x38] sm:$0xff] }
  0x19   : > { %296 = vperm.xlu0 %1702, %v278_v2   ;;  %306 = vperm.xlu1 %1703, %v280_v3   ;;  %v263_v23 = vld [vmem:[%s2957_s1 + $0x8] sm:$0xff]  ;;  %v286_v24 = vld [vmem:[%s2958_s2 + $0x40] sm:$0xff]  ;;  %v264_v26 = vld [vmem:[%s2957_s1 + $0x10] sm:$0xff]  ;;  %s1577_s24 = sshll.u32 %s240_s17, 6  ;;  %s2904_s9 = scalar_lea.hbm %s2961_s5, %s1602_s27 }
  0x1a   : > { %s1601_s8 = sshll.u32 %s245_s7, 6  ;;  %v287_v25 = vld [vmem:[%s2958_s2 + $0x48] sm:$0xff]  ;;  %v288_v27 = vld [vmem:[%s2958_s2 + $0x50] sm:$0xff]  ;;  %v289_v28 = vld [vmem:[%s2958_s2 + $0x58] sm:$0xff]  ;;  %s242_s25 = scalar_lea.vmem [#allocation2], %s1577_s24 }
  0x1b   : > { %s251_s11 = scalar_lea.vmem %s2956_s0, %s1601_s8  ;;  %v265_v29 = vld [vmem:[%s2957_s1 + $0x18] sm:$0xff]  ;;  %v290_v30 = vld [vmem:[%s2958_s2 + $0x60] sm:$0xff]  ;;  %v291_v31 = vld [vmem:[%s2958_s2 + $0x68] sm:$0xff]  ;;  %s1493_s29 = sshll.u32 %s242_s25, 4  ;;  %s2906_s29 = int_to_ptr.vmem [resolvable:$true] %s1493_s29 }
  0x1c   : > { %v255_v4 = vld [vmem:[%s251_s11 + $0x8] sm:$0xff]  ;;  %v257_v5 = vld [vmem:[%s251_s11 + $0x18] sm:$0xff]  ;;  %v254_v6 = vld [vmem:[%s251_s11] sm:$0xff]  ;;  %s2910_s21 = scalar_lea.sflag [#allocation3], %s240_s17  ;;  %s1832_s10 = scalar_lea.vmem %s2906_s29, 1024 }
  0x1d   : > { %v1603_v7 = vpack.c.bf16 %v257_v5, %v255_v4  ;;  %v256_v8 = vld [vmem:[%s251_s11 + $0x10] sm:$0xff]  ;;  %v259_v9 = vld [vmem:[%s251_s11 + $0x28] sm:$0xff]  ;;  %v261_v10 = vld [vmem:[%s251_s11 + $0x38] sm:$0xff]  ;;  %301 = vperm.xlu0 %1702, %v279_v15   ;;  %311 = vperm.xlu1 %1703, %v281_v16   ;;  %p1833_p12 = scmp.ne.s32.totalorder %s2906_s29, %s1832_s10 }
  0x1e   : > { %v1605_v11 = vpack.c.bf16 %v256_v8, %v254_v6  ;;  %v1607_v12 = vpack.c.bf16 %v261_v10, %v259_v9  ;;  %v258_v13 = vld [vmem:[%s251_s11 + $0x20] sm:$0xff]  ;;  %v260_v14 = vld [vmem:[%s251_s11 + $0x30] sm:$0xff]  ;;  %v293_v34 = vld [vmem:[%s2958_s2 + $0x78] sm:$0xff]  ;;  %s1914_s11 = smov [#allocation2]  }
  0x1f   : > { %1604 = vmatprep.subr.bf16.mxu0 %v1603_v7  ;;  %v1609_v17 = vpack.c.bf16 %v260_v14, %v258_v13  ;;  %v266_v32 = vld [vmem:[%s2957_s1 + $0x20] sm:$0xff]  ;;  %v292_v33 = vld [vmem:[%s2958_s2 + $0x70] sm:$0xff]  ;;  %v267_v35 = vld [vmem:[%s2957_s1 + $0x28] sm:$0xff]  ;;  %p1834_p13 = pnand %p1833_p12, %p1987_p4  ;;  %s1836_s12 = sshll.u32 %s1914_s11, 4  ;;  %s1837_s12 = int_to_ptr.vmem [resolvable:$false] %s1836_s12 }
  0x20   : > { %1606 = vmatpush1.bf16.msra.mxu0 %v1605_v11  ;;  %v1356_v36 = vld [vmem:[%s2960_s4] sm:$0xff]  ;;  %v1357_v37 = vld [vmem:[%s2960_s4 + $0x8] sm:$0xff]  ;;  %v268_v38 = vld [vmem:[%s2957_s1 + $0x30] sm:$0xff]  ;;  %s1838_s13 = scalar_lea.vmem %s1837_s12, 2048  ;;  %p1839_p1 = scmp.lt.s32.totalorder %s2906_s29, %s1837_s12 }
  0x21   : > { %1608 = vmatprep.subr.bf16.mxu0 %v1607_v12  ;;  %316 = vperm.xlu0 %1702, %v282_v18   ;;  %v1358_v39 = vld [vmem:[%s2960_s4 + $0x10] sm:$0xff]  ;;  %v1359_v40 = vld [vmem:[%s2960_s4 + $0x18] sm:$0xff]  ;;  %v270_v42 = vld [vmem:[%s2957_s1 + $0x40] sm:$0xff]  ;;  %p1835_p0 = pneg %p1834_p13  ;;  %p1840_p2 = scmp.lt.s32.totalorder %s1838_s13, %s1832_s10 }
  0x22   : > { %321 = vperm.xlu1 %1703, %v283_v19   ;;  %v269_v41 = vld [vmem:[%s2957_s1 + $0x38] sm:$0xff]  ;;  %v271_v43 = vld [vmem:[%s2957_s1 + $0x48] sm:$0xff]  ;;  %v272_v44 = vld [vmem:[%s2957_s1 + $0x50] sm:$0xff] }
  0x23   : > { %v273_v45 = vld [vmem:[%s2957_s1 + $0x58] sm:$0xff]  ;;  %v274_v46 = vld [vmem:[%s2957_s1 + $0x60] sm:$0xff]  ;;  %v275_v47 = vld [vmem:[%s2957_s1 + $0x68] sm:$0xff]  ;;  %p1841_p3 = por %p1840_p2, %p1839_p1 }
  0x24   : > { %1610 = vmatpush1.bf16.msra.mxu0 %v1609_v17  ;;  %v276_v48 = vld [vmem:[%s2957_s1 + $0x70] sm:$0xff]  ;;  %v277_v49 = vld [vmem:[%s2957_s1 + $0x78] sm:$0xff] }
  0x25   : > { %326 = vperm.xlu0 %1702, %v284_v21   ;;  %p1842_p5 = pnand %p1841_p3, %p1835_p0 }
  0x26   : > { %331 = vperm.xlu1 %1703, %v285_v22  }
  0x27   : > { %1580 = vmatmul.mubr.msk.f32.vlgmr.msra.gmra.mrb[0].mxu0 %vm374_vm0, %v262_v20 }
  0x28   : > { %493 = vmatprep.mubr.f32.mxu0 %v2962_v0 }
  0x29   : > { %336 = vperm.xlu0 %1702, %v286_v24  }
  0x2a   : > { %341 = vperm.xlu1 %1703, %v287_v25  }
  0x2b   : > { %1581 = vmatmul.mubr.msk.f32.gmra.mrb[2].mxu0 %vm374_vm0, %v263_v23 }
  0x2c   : > { %499 = vmatprep.mubr.f32.mxu0 %v2962_v0 }
  0x2d   : > { %346 = vperm.xlu0 %1702, %v288_v27  }
  0x2e   : > { %351 = vperm.xlu1 %1703, %v289_v28  }
  0x2f   : > { %1582 = vmatmul.mubr.msk.f32.gmra.mrb[4].mxu0 %vm374_vm0, %v264_v26 }
  0x30   : > { %505 = vmatprep.mubr.f32.mxu0 %v2962_v0 }
  0x31   : > { %356 = vperm.xlu0 %1702, %v290_v30  }
  0x32   : > { %361 = vperm.xlu1 %1703, %v291_v31  }
  0x33   : > { %1583 = vmatmul.mubr.msk.f32.gmra.mrb[6].mxu0 %vm374_vm0, %v265_v29 }
  0x34   : > { %511 = vmatprep.mubr.f32.mxu0 %v2962_v0 }
  0x35   : > { %366 = vperm.xlu0 %1702, %v292_v33  }
  0x36   : > { %371 = vperm.xlu1 %1703, %v293_v34  }
  0x37   : > { %1584 = vmatmul.mubr.msk.f32.gmra.mrb[8].mxu0 %vm374_vm0, %v266_v32 }
  0x38   : > { %517 = vmatprep.mubr.f32.mxu0 %v2962_v0 }
  0x39   : > { %1362 = vperm.xlu0 %1702, %v1356_v36  }
  0x3a   : > { %1367 = vperm.xlu1 %1703, %v1357_v37  }
  0x3b   : > { %1585 = vmatmul.mubr.msk.f32.gmra.mrb[10].mxu0 %vm374_vm0, %v267_v35 }
  0x3c   : > { %523 = vmatprep.mubr.f32.mxu0 %v2962_v0 }
  0x3d   : > { %1372 = vperm.xlu0 %1702, %v1358_v39  }
  0x3e   : > { %1377 = vperm.xlu1 %1703, %v1359_v40  }
  0x3f   : > { %1586 = vmatmul.mubr.msk.f32.gmra.mrb[12].mxu0 %vm374_vm0, %v268_v38 }
  0x40   : > { %529 = vmatprep.mubr.f32.mxu0 %v2962_v0 }
  0x43   : > { %1587 = vmatmul.mubr.msk.f32.gmra.mrb[14].mxu0 %vm374_vm0, %v269_v41 }
  0x44   : > { %535 = vmatprep.mubr.f32.mxu0 %v2962_v0 }
  0x47   : > { %1588 = vmatmul.mubr.msk.f32.gmra.mrb[16].mxu0 %vm374_vm0, %v270_v42 }
  0x48   : > { %541 = vmatprep.mubr.f32.mxu0 %v2962_v0 }
  0x4b   : > { %1589 = vmatmul.mubr.msk.f32.gmra.mrb[18].mxu0 %vm374_vm0, %v271_v43 }
  0x4c   : > { %547 = vmatprep.mubr.f32.mxu0 %v2962_v0 }
  0x4f   : > { %1590 = vmatmul.mubr.msk.f32.gmra.mrb[20].mxu0 %vm374_vm0, %v272_v44 }
  0x50   : > { %553 = vmatprep.mubr.f32.mxu0 %v2962_v0 }
  0x53   : > { %1591 = vmatmul.mubr.msk.f32.gmra.mrb[22].mxu0 %vm374_vm0, %v273_v45 }
  0x54   : > { %559 = vmatprep.mubr.f32.mxu0 %v2962_v0 }
  0x57   : > { %1592 = vmatmul.mubr.msk.f32.gmra.mrb[24].mxu0 %vm374_vm0, %v274_v46 }
  0x58   : > { %565 = vmatprep.mubr.f32.mxu0 %v2962_v0 }
  0x5b   : > { %1593 = vmatmul.mubr.msk.f32.gmra.mrb[26].mxu0 %vm374_vm0, %v275_v47 }
  0x5c   : > { %571 = vmatprep.mubr.f32.mxu0 %v2962_v0 }
  0x5f   : > { %1594 = vmatmul.mubr.msk.f32.gmra.mrb[28].mxu0 %vm374_vm0, %v276_v48 }
  0x60   : > { %577 = vmatprep.mubr.f32.mxu0 %v2962_v0 }
  0x63   : > { %1595 = vmatmul.mubr.msk.f32.gmra.mrb[30].mxu0 %vm374_vm0, %v277_v49 }
  0x98   : > { %v297_v50 = vpop.permute.xlu0 %296  ;;  %v307_v10 = vpop.permute.xlu1 %306 }
  0x9c   : > { %v302_v56 = vpop.permute.xlu0 %301  ;;  %v312_v28 = vpop.permute.xlu1 %311 }
  0xfa   : > { %v489_v51 = vpop.f32.mrb[0].mxu0 }
  0xfb   : > { %v2148_v52 = vadd.f32 %v489_v51, %v297_v50  ;;  %v491_v53 = vpop.f32.mrb[1].mxu0 }
  0xfc   : > { %v2150_v54 = vadd.f32 %v491_v53, %v297_v50 }
  0xfd   : > { %2984 = vst [vmem:[#allocation5_spill] sm:$0xff] %v2148_v52  ;;  %v584_v55 = vand.u32 2147483647, %v2148_v52 }
  0xfe   : > { %2985 = vst [vmem:[#allocation6_spill] sm:$0xff] %v2150_v54  ;;  %v585_v57 = vand.u32 2147483647, %v2150_v54  ;;  %v495_v58 = vpop.f32.mrb[2].mxu0 }
  0xff   : > { %v616_v59 = vmul.f32 0.70710677, %v584_v55  ;;  %v2154_v60 = vadd.f32 %v495_v58, %v302_v56  ;;  %v497_v61 = vpop.f32.mrb[3].mxu0  ;;  %v2167_v24 = vmul.f32 0.5, %v584_v55 }
 0x100   : > { %v617_v62 = vmul.f32 0.70710677, %v585_v57  ;;  %v2156_v63 = vadd.f32 %v497_v61, %v302_v56  ;;  %v2171_v29 = vmul.f32 0.5, %v585_v57  ;;  %v317_v61 = vpop.permute.xlu0 %316 }
 0x101   : > { %2986 = vst [vmem:[#allocation7_spill] sm:$0xff] %v2154_v60  ;;  %v1128_v1 = vmul.f32 %v616_v59, %v616_v59  ;;  %v586_v2 = vand.u32 2147483647, %v2154_v60  ;;  %v648_v3 = vmul.f32 0.3275911, %v616_v59  ;;  %2988 = vst [vmem:[#allocation9_spill] sm:$0xff] %v2167_v24 }
 0x102   : > { %2987 = vst [vmem:[#allocation8_spill] sm:$0xff] %v2156_v63  ;;  %v1129_v4 = vmul.f32 %v617_v62, %v617_v62  ;;  %v587_v5 = vand.u32 2147483647, %v2156_v63  ;;  %v501_v6 = vpop.f32.mrb[4].mxu0  ;;  %v649_v7 = vmul.f32 0.3275911, %v617_v62 }
 0x103   : > { %v618_v8 = vmul.f32 0.70710677, %v586_v2  ;;  %v503_v9 = vpop.f32.mrb[5].mxu0  ;;  %v1160_v12 = vsub.f32 0.0, %v1128_v1  ;;  %v680_v13 = vadd.f32 1.0, %v648_v3  ;;  %v2162_v18 = vadd.f32 %v501_v6, %v307_v10  ;;  %2989 = vst [vmem:[#allocation10_spill] sm:$0xff] %v2171_v29 }
 0x104   : > { %v619_v11 = vmul.f32 0.70710677, %v587_v5  ;;  %v1161_v14 = vsub.f32 0.0, %v1129_v4  ;;  %v681_v16 = vadd.f32 1.0, %v649_v7  ;;  %v2165_v23 = vadd.f32 %v503_v9, %v307_v10 }
 0x105   : > { %v650_v17 = vmul.f32 0.3275911, %v618_v8  ;;  %v1130_v21 = vmul.f32 %v618_v8, %v618_v8  ;;  %v1192_v25 = vmul.f32 1.442695, %v1160_v12  ;;  %v588_v27 = vand.u32 2147483647, %v2162_v18 }
 0x106   : > { %v507_v15 = vpop.f32.mrb[6].mxu0  ;;  %v651_v22 = vmul.f32 0.3275911, %v619_v11  ;;  %1704 = vrcp.f32 %v680_v13  ;;  %v1194_v30 = vmul.f32 1.442695, %v1161_v14  ;;  %v1131_v41 = vmul.f32 %v619_v11, %v619_v11 }
 0x107   : > { %v509_v19 = vpop.f32.mrb[7].mxu0  ;;  %v589_v31 = vand.u32 2147483647, %v2165_v23  ;;  %1706 = vrcp.f32 %v681_v16  ;;  %v682_v33 = vadd.f32 1.0, %v650_v17  ;;  %v620_v34 = vmul.f32 0.70710677, %v588_v27  ;;  %v322_v17 = vpop.permute.xlu1 %321 }
 0x108   : > { %v2174_v35 = vadd.f32 %v507_v15, %v312_v28  ;;  %v1162_v37 = vsub.f32 0.0, %v1130_v21  ;;  %v683_v38 = vadd.f32 1.0, %v651_v22  ;;  %v2178_v40 = vadd.f32 %v509_v19, %v312_v28 }
 0x109   : > { %v621_v39 = vmul.f32 0.70710677, %v589_v31  ;;  %1708 = vpow2.f32 %v1192_v25  ;;  %v652_v42 = vmul.f32 0.3275911, %v620_v34  ;;  %v1132_v49 = vmul.f32 %v620_v34, %v620_v34 }
 0x10a   : > { %v513_v32 = vpop.f32.mrb[8].mxu0  ;;  %v590_v43 = vand.u32 2147483647, %v2174_v35  ;;  %1710 = vpow2.f32 %v1194_v30  ;;  %v591_v46 = vand.u32 2147483647, %v2178_v40  ;;  %v1163_v58 = vsub.f32 0.0, %v1131_v41 }
 0x10b   : > { %v515_v36 = vpop.f32.mrb[9].mxu0  ;;  %v653_v45 = vmul.f32 0.3275911, %v621_v39  ;;  %1712 = vrcp.f32 %v682_v33  ;;  %v684_v48 = vadd.f32 1.0, %v652_v42  ;;  %v1196_v53 = vmul.f32 1.442695, %v1162_v37 }
 0x10c   : > { %v622_v50 = vmul.f32 0.70710677, %v590_v43  ;;  %1714 = vrcp.f32 %v683_v38  ;;  %v623_v56 = vmul.f32 0.70710677, %v591_v46  ;;  %v2190_v62 = vmul.f32 0.5, %v586_v2 }
 0x10d   : > { %v685_v55 = vadd.f32 1.0, %v653_v45  ;;  %1716 = vrcp.f32 %v684_v48  ;;  %v2192_v1 = vmul.f32 0.5, %v587_v5  ;;  %v1164_v6 = vsub.f32 0.0, %v1132_v49 }
 0x10e   : > { %v519_v47 = vpop.f32.mrb[10].mxu0  ;;  %v654_v59 = vmul.f32 0.3275911, %v622_v50  ;;  %2990 = vst [vmem:[#allocation11_spill] sm:$0xff] %v2190_v62  ;;  %v655_v3 = vmul.f32 0.3275911, %v623_v56  ;;  %v1133_v7 = vmul.f32 %v621_v39, %v621_v39  ;;  %v2196_v9 = vadd.f32 %v513_v32, %v317_v61 }
 0x10f   : > { %v521_v51 = vpop.f32.mrb[11].mxu0  ;;  %2991 = vst [vmem:[#allocation12_spill] sm:$0xff] %v2192_v1  ;;  %1718 = vrcp.f32 %v685_v55  ;;  %v2203_v13 = vadd.f32 %v515_v36, %v317_v61  ;;  %v1198_v14 = vmul.f32 1.442695, %v1163_v58  ;;  %v2209_v19 = vmul.f32 0.5, %v588_v27 }
 0x110   : > { %v686_v8 = vadd.f32 1.0, %v654_v59  ;;  %v2200_v11 = vpop.eup %1704  ;;  %1720 = vpow2.f32 %v1196_v53  ;;  %v687_v2 = vadd.f32 1.0, %v655_v3  ;;  %v592_v16 = vand.u32 2147483647, %v2196_v9 }
 0x111   : > { %2992 = vst [vmem:[#allocation13_spill] sm:$0xff] %v2200_v11  ;;  %v2205_v5 = vpop.eup %1706  ;;  %v1134_v21 = vmul.f32 %v622_v50, %v622_v50  ;;  %v2966_v22 = vand.u32 2147483647, %v2203_v13  ;;  %v1200_v30 = vmul.f32 1.442695, %v1164_v6  ;;  %v1165_v32 = vsub.f32 0.0, %v1133_v7 }
 0x112   : > { %v2194_v4 = vpop.f32.mrb[12].mxu0  ;;  %2993 = vst [vmem:[#allocation14_spill] sm:$0xff] %v2205_v5  ;;  %1722 = vrcp.f32 %v686_v8  ;;  %v624_v33 = vmul.f32 0.70710677, %v592_v16  ;;  %v2218_v34 = vadd.f32 %v519_v47, %v322_v17  ;;  %v2226_v27 = vmul.f32 0.5, %v589_v31 }
 0x113   : > { %v2198_v10 = vpop.f32.mrb[13].mxu0  ;;  %1724 = vrcp.f32 %v687_v2  ;;  %v2214_v28 = vpop.eup %1708  ;;  %v1135_v38 = vmul.f32 %v623_v56, %v623_v56  ;;  %v625_v39 = vmul.f32 0.70710677, %v2966_v22  ;;  %v2230_v41 = vadd.f32 %v521_v51, %v322_v17 }
 0x114   : > { %2994 = vst [vmem:[#allocation15_spill] sm:$0xff] %v2214_v28  ;;  %v2222_v37 = vpop.eup %1710  ;;  %v656_v48 = vmul.f32 0.3275911, %v624_v33  ;;  %v2965_v49 = vand.u32 2147483647, %v2218_v34  ;;  %1726 = vpow2.f32 %v1198_v14  ;;  %v1166_v31 = vsub.f32 0.0, %v1134_v21 }
 0x115   : > { %2995 = vst [vmem:[#allocation16_spill] sm:$0xff] %v2222_v37  ;;  %v2232_v42 = vpop.eup %1712  ;;  %v657_v53 = vmul.f32 0.3275911, %v625_v39  ;;  %v2964_v55 = vand.u32 2147483647, %v2230_v41  ;;  %1728 = vpow2.f32 %v1200_v30  ;;  %v1167_v8 = vsub.f32 0.0, %v1135_v38 }
 0x116   : > { %v2212_v25 = vpop.f32.mrb[14].mxu0  ;;  %2996 = vst [vmem:[#allocation17_spill] sm:$0xff] %v2232_v42  ;;  %v2237_v50 = vpop.eup %1714  ;;  %v1202_v58 = vmul.f32 1.442695, %v1165_v32  ;;  %v688_v59 = vadd.f32 1.0, %v656_v48  ;;  %v2258_v21 = vmul.f32 0.5, %v590_v43  ;;  %v1136_v47 = vmul.f32 %v624_v33, %v624_v33 }
 0x117   : > { %v2220_v36 = vpop.f32.mrb[15].mxu0  ;;  %2997 = vst [vmem:[#allocation18_spill] sm:$0xff] %v2237_v50  ;;  %v2242_v51 = vpop.eup %1716  ;;  %v626_v61 = vmul.f32 0.70710677, %v2965_v49  ;;  %v689_v2 = vadd.f32 1.0, %v657_v53  ;;  %v2264_v38 = vmul.f32 0.5, %v591_v46  ;;  %v1137_v22 = vmul.f32 %v625_v39, %v625_v39 }
 0x118   : > { %v780_v7 = vmul.f32 1.0614054, %v2242_v51  ;;  %v2253_v14 = vmul.f32 0.70710677, %v2964_v55  ;;  %1730 = vrcp.f32 %v688_v59  ;;  %v1204_v0 = vmul.f32 1.442695, %v1166_v31  ;;  %v2285_v33 = vpop.permute.xlu0 %326 }
 0x119   : > { %v2248_v6 = vpop.eup %1718  ;;  %v658_v30 = vmul.f32 0.3275911, %v626_v61  ;;  %1732 = vrcp.f32 %v689_v2  ;;  %v1206_v46 = vmul.f32 1.442695, %v1167_v8 }
 0x11a   : > { %v2240_v56 = vpop.f32.mrb[16].mxu0  ;;  %v781_v17 = vmul.f32 1.0614054, %v2248_v6  ;;  %v2260_v32 = vpop.eup %1720  ;;  %v812_v48 = vadd.f32 -1.4531521, %v780_v7  ;;  %1734 = vpow2.f32 %v1202_v58  ;;  %v1139_v37 = vmul.f32 %v2253_v14, %v2253_v14 }
 0x11b   : > { %v2246_v3 = vpop.f32.mrb[17].mxu0  ;;  %2998 = vst [vmem:[#allocation19_spill] sm:$0xff] %v2260_v32  ;;  %v690_v57 = vadd.f32 1.0, %v658_v30  ;;  %v659_v43 = vmul.f32 0.3275911, %v2253_v14 }
 0x11c   : > { %v2268_v44 = vpop.eup %1722  ;;  %v813_v20 = vadd.f32 -1.4531521, %v781_v17  ;;  %v844_v31 = vmul.f32 %v2242_v51, %v812_v48 }
 0x11d   : > { %v2273_v26 = vpop.eup %1724  ;;  %v782_v7 = vmul.f32 1.0614054, %v2268_v44  ;;  %1736 = vrcp.f32 %v690_v57  ;;  %v691_v17 = vadd.f32 1.0, %v659_v43  ;;  %v1168_v43 = vsub.f32 0.0, %v1136_v47 }
 0x11e   : > { %v2266_v53 = vpop.f32.mrb[18].mxu0  ;;  %v845_v2 = vmul.f32 %v2248_v6, %v813_v20  ;;  %v783_v45 = vmul.f32 1.0614054, %v2273_v26  ;;  %v876_v58 = vadd.f32 1.4214138, %v844_v31  ;;  %v2283_v8 = vpop.eup %1726 }
 0x11f   : > { %v2271_v59 = vpop.f32.mrb[19].mxu0  ;;  %v814_v30 = vadd.f32 -1.4531521, %v782_v7  ;;  %1738 = vrcp.f32 %v691_v17  ;;  %2999 = vst [vmem:[#allocation20_spill] sm:$0xff] %v2283_v8  ;;  %v2291_v7 = vpop.eup %1728  ;;  %v2297_v17 = vadd.f32 %v2194_v4, %v2285_v33 }
 0x120   : > { %v877_v55 = vadd.f32 1.4214138, %v845_v2  ;;  %v815_v49 = vadd.f32 -1.4531521, %v783_v45  ;;  %v908_v20 = vmul.f32 %v2242_v51, %v876_v58  ;;  %1740 = vpow2.f32 %v1204_v0 }
 0x121   : > { %v846_v57 = vmul.f32 %v2268_v44, %v814_v30  ;;  %v1138_v2 = vmul.f32 %v626_v61, %v626_v61  ;;  %1742 = vpow2.f32 %v1206_v46  ;;  %v2301_v0 = vmul.f32 0.5, %v592_v16 }
 0x122   : > { %v2281_v48 = vpop.f32.mrb[20].mxu0  ;;  %v909_v45 = vmul.f32 %v2248_v6, %v877_v55  ;;  %v847_v39 = vmul.f32 %v2273_v26, %v815_v49  ;;  %v940_v12 = vadd.f32 -0.28449672, %v908_v20  ;;  %v2303_v47 = vpop.eup %1730  ;;  %v3000_v55 = vand.u32 2147483647, %v2203_v13 }
 0x123   : > { %v2289_v31 = vpop.f32.mrb[21].mxu0  ;;  %v878_v15 = vadd.f32 1.4214138, %v846_v57  ;;  %v1169_v49 = vsub.f32 0.0, %v1137_v22  ;;  %v2309_v61 = vpop.eup %1732  ;;  %v784_v20 = vmul.f32 1.0614054, %v2303_v47 }
 0x124   : > { %v941_v58 = vadd.f32 -0.28449672, %v909_v45  ;;  %v879_v30 = vadd.f32 1.4214138, %v847_v39  ;;  %v2307_v60 = vmul.f32 0.5, %v3000_v55  ;;  %v2317_v52 = vpop.eup %1734  ;;  %v1170_v22 = vsub.f32 0.0, %v1138_v2 }
 0x125   : > { %v910_v4 = vmul.f32 %v2268_v44, %v878_v15  ;;  %v1208_v39 = vmul.f32 1.442695, %v1168_v43  ;;  %v785_v55 = vmul.f32 1.0614054, %v2309_v61  ;;  %v972_v15 = vmul.f32 %v2242_v51, %v940_v12 }
 0x126   : > { %v2315_v57 = vpop.f32.mrb[22].mxu0  ;;  %v911_v45 = vmul.f32 %v2273_v26, %v879_v30  ;;  %v816_v32 = vadd.f32 -1.4531521, %v784_v20  ;;  %v973_v16 = vmul.f32 %v2248_v6, %v941_v58  ;;  %v1210_v1 = vmul.f32 1.442695, %v1169_v49 }
 0x127   : > { %v2321_v62 = vpop.f32.mrb[23].mxu0  ;;  %v942_v24 = vadd.f32 -0.28449672, %v910_v4  ;;  %v2325_v28 = vpop.eup %1736  ;;  %v817_v54 = vadd.f32 -1.4531521, %v785_v55  ;;  %1744 = vpow2.f32 %v1208_v39 }
 0x128   : > { %v943_v63 = vadd.f32 -0.28449672, %v911_v45  ;;  %v848_v30 = vmul.f32 %v2303_v47, %v816_v32  ;;  %v786_v2 = vmul.f32 1.0614054, %v2325_v28  ;;  %v3001_v29 = vand.u32 2147483647, %v2297_v17 }
 0x129   : > { %v974_v43 = vmul.f32 %v2268_v44, %v942_v24  ;;  %v2335_v20 = vpop.eup %1738  ;;  %v849_v58 = vmul.f32 %v2309_v61, %v817_v54  ;;  %v1212_v45 = vmul.f32 1.442695, %v1170_v22  ;;  %v1004_v55 = vadd.f32 0.2548296, %v972_v15 }
 0x12a   : > { %v628_v12 = vmul.f32 0.70710677, %v3001_v29  ;;  %v2333_v4 = vpop.f32.mrb[24].mxu0  ;;  %v975_v46 = vmul.f32 %v2273_v26, %v943_v63  ;;  %v1741_v24 = vpop.eup %1740  ;;  %v880_v32 = vadd.f32 1.4214138, %v848_v30  ;;  %1746 = vpow2.f32 %v1210_v1 }
 0x12b   : > { %3002 = vst [vmem:[#allocation21_spill] sm:$0xff] %v2333_v4  ;;  %v2339_v49 = vpop.f32.mrb[25].mxu0  ;;  %v818_v8 = vadd.f32 -1.4531521, %v786_v2  ;;  %v1005_v29 = vadd.f32 0.2548296, %v973_v16  ;;  %v1743_v50 = vpop.eup %1742  ;;  %1748 = vpow2.f32 %v1212_v45  ;;  %v1036_v1 = vmul.f32 %v2242_v51, %v1004_v55 }
 0x12c   : > { %3003 = vst [vmem:[#allocation22_spill] sm:$0xff] %v2339_v49  ;;  %v881_v42 = vadd.f32 1.4214138, %v849_v58  ;;  %v787_v11 = vmul.f32 1.0614054, %v2335_v20  ;;  %v912_v39 = vmul.f32 %v2303_v47, %v880_v32  ;;  %v1171_v49 = vsub.f32 0.0, %v1139_v37 }
 0x12d   : > { %v1006_v63 = vadd.f32 0.2548296, %v974_v43  ;;  %v850_v54 = vmul.f32 %v2325_v28, %v818_v8  ;;  %v660_v22 = vmul.f32 0.3275911, %v628_v12  ;;  %v1007_v15 = vadd.f32 0.2548296, %v975_v46 }
 0x12e   : > { %v2346_v5 = vpop.f32.mrb[26].mxu0  ;;  %v913_v30 = vmul.f32 %v2309_v61, %v881_v42  ;;  %v819_v2 = vadd.f32 -1.4531521, %v787_v11  ;;  %v944_v16 = vadd.f32 -0.28449672, %v912_v39  ;;  %v1037_v32 = vmul.f32 %v2248_v6, %v1005_v29  ;;  %v332_v42 = vpop.permute.xlu1 %331 }
 0x12f   : > { %v2349_v14 = vpop.f32.mrb[27].mxu0  ;;  %v882_v58 = vadd.f32 1.4214138, %v850_v54  ;;  %v2358_v46 = vadd.f32 %v2198_v10, %v2285_v33  ;;  %v1038_v11 = vmul.f32 %v2268_v44, %v1006_v63  ;;  %v692_v55 = vadd.f32 1.0, %v660_v22 }
 0x130   : > { %v945_v8 = vadd.f32 -0.28449672, %v913_v30  ;;  %v851_v4 = vmul.f32 %v2335_v20, %v819_v2  ;;  %v976_v45 = vmul.f32 %v2303_v47, %v944_v16  ;;  %v1039_v37 = vmul.f32 %v2273_v26, %v1007_v15 }
 0x131   : > { %v914_v51 = vmul.f32 %v2325_v28, %v882_v58  ;;  %v2366_v29 = vadd.f32 %v2212_v25, %v332_v42  ;;  %v1260_v10 = vmul.f32 %v2291_v7, %v1036_v1  ;;  %1750 = vrcp.f32 %v692_v55  ;;  %v1745_v44 = vpop.eup %1744 }
 0x132   : > { %v2352_v43 = vpop.f32.mrb[28].mxu0  ;;  %v977_v39 = vmul.f32 %v2309_v61, %v945_v8  ;;  %v883_v6 = vadd.f32 1.4214138, %v851_v4  ;;  %v1008_v33 = vadd.f32 0.2548296, %v976_v45  ;;  %v1261_v63 = vmul.f32 %v2317_v52, %v1037_v32 }
 0x133   : > { %v2368_v54 = vpop.f32.mrb[29].mxu0  ;;  %v946_v30 = vadd.f32 -0.28449672, %v914_v51  ;;  %v1214_v2 = vmul.f32 1.442695, %v1171_v49  ;;  %v1140_v26 = vmul.f32 %v628_v12, %v628_v12  ;;  %v1262_v15 = vmul.f32 %v1741_v24, %v1038_v11 }
 0x134   : > { %v915_v22 = vmul.f32 %v2335_v20, %v883_v6  ;;  %v1009_v16 = vadd.f32 0.2548296, %v977_v39  ;;  %v597_v25 = vand.u32 2147483647, %v2358_v46  ;;  %v1747_v8 = vpop.eup %1746  ;;  %v1263_v7 = vmul.f32 %v1743_v50, %v1039_v37 }
 0x135   : > { %v978_v4 = vmul.f32 %v2325_v28, %v946_v30  ;;  %v3004_v1 = vand.u32 2147483647, %v2218_v34  ;;  %v2975_v52 = vand.u32 2147483647, %v2366_v29  ;;  %v1292_v12 = vmul.f32 %v1260_v10, %v2209_v19  ;;  %v1749_v39 = vpop.eup %1748 }
 0x136   : > { %v2375_v58 = vpop.f32.mrb[30].mxu0  ;;  %v947_v51 = vadd.f32 -0.28449672, %v915_v22  ;;  %v1040_v49 = vmul.f32 %v2303_v47, %v1008_v33  ;;  %v3005_v24 = vand.u32 2147483647, %v2230_v41  ;;  %v1293_v50 = vmul.f32 %v1261_v63, %v2226_v27  ;;  %v337_v33 = vpop.permute.xlu0 %336 }
 0x137   : > { %v1106_v45 = vmul.f32 0.5, %v3004_v1  ;;  %v2380_v32 = vpop.f32.mrb[31].mxu0  ;;  %v629_v55 = vmul.f32 0.70710677, %v597_v25  ;;  %v1010_v37 = vadd.f32 0.2548296, %v978_v4  ;;  %v2392_v30 = vadd.f32 %v2220_v36, %v332_v42 }
 0x138   : > { %v2386_v11 = vmul.f32 0.5, %v3005_v24  ;;  %v630_v6 = vmul.f32 0.70710677, %v2975_v52  ;;  %v1294_v22 = vmul.f32 %v1262_v15, %v2258_v21  ;;  %v1041_v19 = vmul.f32 %v2309_v61, %v1009_v16 }
 0x139   : > { %v1172_v47 = vsub.f32 0.0, %v1140_v26  ;;  %v661_v10 = vmul.f32 0.3275911, %v629_v55  ;;  %v1295_v1 = vmul.f32 %v1263_v7, %v2264_v38  ;;  %v979_v24 = vmul.f32 %v2335_v20, %v947_v51 }
 0x13a   : > { %1752 = vpow2.f32 %v1214_v2  ;;  %v662_v27 = vmul.f32 0.3275911, %v630_v6  ;;  %v3006_v63 = vmax.f32 %v2162_v18, 0.0  ;;  %v1264_v52 = vmul.f32 %v1745_v44, %v1040_v49 }
 0x13b   : > { %v693_v36 = vadd.f32 1.0, %v661_v10  ;;  %v2403_v42 = vadd.f32 %v2240_v56, %v337_v33  ;;  %v3007_v21 = vmax.f32 %v2165_v23, 0.0  ;;  %v1042_v26 = vmul.f32 %v2325_v28, %v1010_v37  ;;  %v2411_v2 = vpop.eup %1750 }
 0x13c   : > { %v2400_v4 = vsub.f32 %v3006_v63, %v1292_v12  ;;  %v694_v15 = vadd.f32 1.0, %v662_v27  ;;  %v3008_v18 = vmax.f32 %v2174_v35, 0.0  ;;  %v1265_v44 = vmul.f32 %v1747_v8, %v1041_v19 }
 0x13d   : > { %v2407_v61 = vsub.f32 %v3007_v21, %v1293_v50  ;;  %v1216_v7 = vmul.f32 1.442695, %v1172_v47  ;;  %1754 = vrcp.f32 %v693_v36  ;;  %v3009_v56 = vmax.f32 %v2178_v40, 0.0 }
 0x13e   : > { %v2415_v16 = vsub.f32 %v3008_v18, %v1294_v22  ;;  %v1011_v23 = vadd.f32 0.2548296, %v979_v24  ;;  %v788_v12 = vmul.f32 1.0614054, %v2411_v2  ;;  %1756 = vrcp.f32 %v694_v15 }
 0x13f   : > { %v2419_v51 = vsub.f32 %v3009_v56, %v1295_v1  ;;  %v1296_v28 = vmul.f32 %v1264_v52, %v2301_v0  ;;  %v3010_v49 = vand.u32 2147483647, %v2297_v17  ;;  %v1141_v35 = vmul.f32 %v629_v55, %v629_v55 }
 0x140   : > { %v599_v37 = vand.u32 2147483647, %v2392_v30  ;;  %v1266_v8 = vmul.f32 %v1749_v39, %v1042_v26  ;;  %v820_v22 = vadd.f32 -1.4531521, %v788_v12  ;;  %v600_v40 = vand.u32 2147483647, %v2403_v42  ;;  %v342_v39 = vpop.permute.xlu1 %341 }
 0x141   : > { %v2425_v50 = vmul.f32 0.5, %v3010_v49  ;;  %v1297_v47 = vmul.f32 %v1265_v44, %v2307_v60  ;;  %1758 = vpow2.f32 %v1216_v7  ;;  %v2431_v10 = vmul.f32 0.5, %v597_v25 }
 0x142   : > { %v631_v1 = vmul.f32 0.70710677, %v599_v37  ;;  %v1043_v0 = vmul.f32 %v2335_v20, %v1011_v23  ;;  %v852_v52 = vmul.f32 %v2411_v2, %v820_v22  ;;  %v1142_v24 = vmul.f32 %v630_v6, %v630_v6 }
 0x143   : > { %v632_v55 = vmul.f32 0.70710677, %v600_v40  ;;  %v3011_v27 = vmax.f32 %v2196_v9, 0.0  ;;  %v1173_v36 = vsub.f32 0.0, %v1141_v35  ;;  %v2442_v60 = vadd.f32 %v2246_v3, %v337_v33 }
 0x144   : > { %v663_v21 = vmul.f32 0.3275911, %v631_v1  ;;  %v1753_v25 = vpop.eup %1752  ;;  %v1298_v26 = vmul.f32 %v1266_v8, %v1106_v45  ;;  %v884_v15 = vadd.f32 1.4214138, %v852_v52  ;;  %v2445_v18 = vadd.f32 %v2266_v53, %v342_v39 }
 0x145   : > { %v2439_v63 = vsub.f32 %v3011_v27, %v1296_v28  ;;  %v664_v20 = vmul.f32 0.3275911, %v632_v55  ;;  %v3013_v6 = vmax.f32 %v2203_v13, 0.0  ;;  %v601_v56 = vand.u32 2147483647, %v2442_v60 }
 0x146   : > { %v695_v7 = vadd.f32 1.0, %v663_v21  ;;  %v1267_v23 = vmul.f32 %v1753_v25, %v1043_v0  ;;  %v1174_v12 = vsub.f32 0.0, %v1142_v24  ;;  %v2978_v33 = vand.u32 2147483647, %v2445_v18 }
 0x147   : > { %3012 = vst [vmem:[#allocation23_spill] sm:$0xff] %v2439_v63  ;;  %v2449_v44 = vsub.f32 %v3013_v6, %v1297_v47  ;;  %v696_v3 = vadd.f32 1.0, %v664_v20  ;;  %v2454_v45 = vpop.eup %1754  ;;  %v916_v28 = vmul.f32 %v2411_v2, %v884_v15  ;;  %v1218_v53 = vmul.f32 1.442695, %v1173_v36 }
 0x148   : > { %1760 = vrcp.f32 %v695_v7  ;;  %v633_v13 = vmul.f32 0.70710677, %v601_v56  ;;  %v2459_v49 = vpop.eup %1756  ;;  %v3014_v35 = vmax.f32 %v2218_v34, 0.0  ;;  %v789_v22 = vmul.f32 1.0614054, %v2454_v45 }
 0x149   : > { %v3016_v47 = vand.u32 2147483647, %v2366_v29  ;;  %1762 = vrcp.f32 %v696_v3  ;;  %v790_v52 = vmul.f32 1.0614054, %v2459_v49  ;;  %v1143_v27 = vmul.f32 %v631_v1, %v631_v1 }
 0x14a   : > { %v2463_v8 = vsub.f32 %v3014_v35, %v1298_v26  ;;  %v665_v36 = vmul.f32 0.3275911, %v633_v13  ;;  %v1299_v21 = vmul.f32 %v1267_v23, %v2386_v11  ;;  %v821_v25 = vadd.f32 -1.4531521, %v789_v22  ;;  %v2482_v22 = vpop.permute.xlu0 %346 }
 0x14b   : > { %v2468_v0 = vmul.f32 0.5, %v3016_v47  ;;  %v1220_v15 = vmul.f32 1.442695, %v1174_v12  ;;  %v634_v34 = vmul.f32 0.70710677, %v2978_v33  ;;  %v2475_v26 = vpop.eup %1758  ;;  %1764 = vpow2.f32 %v1218_v53 }
 0x14c   : > { %3015 = vst [vmem:[#allocation24_spill] sm:$0xff] %v2463_v8  ;;  %v948_v20 = vadd.f32 -0.28449672, %v916_v28  ;;  %v822_v6 = vadd.f32 -1.4531521, %v790_v52  ;;  %v697_v7 = vadd.f32 1.0, %v665_v36  ;;  %v853_v3 = vmul.f32 %v2454_v45, %v821_v25 }
 0x14d   : > { %v2478_v35 = vmul.f32 0.5, %v599_v37  ;;  %v666_v47 = vmul.f32 0.3275911, %v634_v34  ;;  %v1175_v23 = vsub.f32 0.0, %v1143_v27  ;;  %v1144_v12 = vmul.f32 %v632_v55, %v632_v55 }
 0x14e   : > { %v854_v11 = vmul.f32 %v2459_v49, %v822_v6  ;;  %1766 = vrcp.f32 %v697_v7  ;;  %v3017_v24 = vmax.f32 %v2230_v41, 0.0  ;;  %v885_v53 = vadd.f32 1.4214138, %v853_v3 }
 0x14f   : > { %v698_v52 = vadd.f32 1.0, %v666_v47  ;;  %v2489_v36 = vadd.f32 %v2271_v59, %v342_v39  ;;  %v980_v37 = vmul.f32 %v2411_v2, %v948_v20  ;;  %v2494_v6 = vmul.f32 0.5, %v600_v40 }
 0x150   : > { %v2486_v28 = vsub.f32 %v3017_v24, %v1299_v21  ;;  %v886_v25 = vadd.f32 1.4214138, %v854_v11  ;;  %v2498_v55 = vadd.f32 %v2281_v48, %v2482_v22  ;;  %v917_v41 = vmul.f32 %v2454_v45, %v885_v53 }
 0x151   : > { %1768 = vrcp.f32 %v698_v52  ;;  %v2976_v27 = vand.u32 2147483647, %v2489_v36  ;;  %v1222_v21 = vmul.f32 1.442695, %v1175_v23  ;;  %v1176_v20 = vsub.f32 0.0, %v1144_v12 }
 0x152   : > { %v2503_v59 = vpop.eup %1760  ;;  %v918_v39 = vmul.f32 %v2459_v49, %v886_v25  ;;  %v2977_v40 = vand.u32 2147483647, %v2498_v55  ;;  %v949_v3 = vadd.f32 -0.28449672, %v917_v41  ;;  %1770 = vpow2.f32 %v1220_v15 }
 0x153   : > { %v2507_v7 = vpop.eup %1762  ;;  %v791_v48 = vmul.f32 1.0614054, %v2503_v59  ;;  %v635_v47 = vmul.f32 0.70710677, %v2976_v27  ;;  %v1012_v11 = vadd.f32 0.2548296, %v980_v37  ;;  %v1145_v24 = vmul.f32 %v633_v13, %v633_v13 }
 0x154   : > { %v950_v53 = vadd.f32 -0.28449672, %v918_v39  ;;  %v792_v52 = vmul.f32 1.0614054, %v2507_v7  ;;  %v2515_v23 = vmul.f32 0.5, %v601_v56  ;;  %v1146_v12 = vmul.f32 %v634_v34, %v634_v34 }
 0x155   : > { %v823_v1 = vadd.f32 -1.4531521, %v791_v48  ;;  %v667_v25 = vmul.f32 0.3275911, %v635_v47  ;;  %v1765_v9 = vpop.eup %1764  ;;  %v981_v15 = vmul.f32 %v2454_v45, %v949_v3  ;;  %v1224_v19 = vmul.f32 1.442695, %v1176_v20 }
 0x156   : > { %v824_v41 = vadd.f32 -1.4531521, %v792_v52  ;;  %v2520_v38 = vmul.f32 0.70710677, %v2977_v40  ;;  %v982_v37 = vmul.f32 %v2459_v49, %v950_v53  ;;  %1772 = vpow2.f32 %v1222_v21 }
 0x157   : > { %v855_v13 = vmul.f32 %v2503_v59, %v823_v1  ;;  %v699_v39 = vadd.f32 1.0, %v667_v25  ;;  %v1044_v56 = vmul.f32 %v2411_v2, %v1012_v11  ;;  %v1177_v27 = vsub.f32 0.0, %v1145_v24 }
 0x158   : > { %v2524_v48 = vpop.eup %1766  ;;  %v856_v34 = vmul.f32 %v2507_v7, %v824_v41  ;;  %v668_v3 = vmul.f32 0.3275911, %v2520_v38  ;;  %v1178_v40 = vsub.f32 0.0, %v1146_v12  ;;  %v1013_v33 = vadd.f32 0.2548296, %v981_v15 }
 0x159   : > { %v887_v20 = vadd.f32 1.4214138, %v855_v13  ;;  %v793_v52 = vmul.f32 1.0614054, %v2524_v48  ;;  %1774 = vrcp.f32 %v699_v39  ;;  %v1014_v25 = vadd.f32 0.2548296, %v982_v37 }
 0x15a   : > { %v888_v53 = vadd.f32 1.4214138, %v856_v34  ;;  %1776 = vpow2.f32 %v1224_v19  ;;  %v700_v1 = vadd.f32 1.0, %v668_v3  ;;  %v1268_v24 = vmul.f32 %v2475_v26, %v1044_v56 }
 0x15b   : > { %v2530_v21 = vpop.eup %1768  ;;  %v919_v8 = vmul.f32 %v2503_v59, %v887_v20  ;;  %v825_v2 = vadd.f32 -1.4531521, %v793_v52  ;;  %v1226_v13 = vmul.f32 1.442695, %v1177_v27  ;;  %v1228_v34 = vmul.f32 1.442695, %v1178_v40 }
 0x15c   : > { %v920_v41 = vmul.f32 %v2507_v7, %v888_v53  ;;  %v794_v12 = vmul.f32 1.0614054, %v2530_v21  ;;  %v1771_v39 = vpop.eup %1770  ;;  %1778 = vrcp.f32 %v700_v1  ;;  %v1045_v37 = vmul.f32 %v2454_v45, %v1013_v33 }
 0x15d   : > { %v951_v15 = vadd.f32 -0.28449672, %v919_v8  ;;  %v857_v19 = vmul.f32 %v2524_v48, %v825_v2  ;;  %v1147_v52 = vmul.f32 %v635_v47, %v635_v47  ;;  %v1046_v11 = vmul.f32 %v2459_v49, %v1014_v25  ;;  %v352_v25 = vpop.permute.xlu1 %351 }
 0x15e   : > { %v952_v3 = vadd.f32 -0.28449672, %v920_v41  ;;  %v826_v20 = vadd.f32 -1.4531521, %v794_v12  ;;  %v3018_v26 = vand.u32 2147483647, %v2445_v18  ;;  %v2546_v27 = vadd.f32 %v2289_v31, %v2482_v22 }
 0x15f   : > { %v889_v63 = vadd.f32 1.4214138, %v857_v19  ;;  %v983_v8 = vmul.f32 %v2503_v59, %v951_v15  ;;  %1780 = vpow2.f32 %v1226_v13  ;;  %v1300_v47 = vmul.f32 %v1268_v24, %v2425_v50 }
 0x160   : > { %v2542_v56 = vmul.f32 0.5, %v3018_v26  ;;  %3019 = vst [vmem:[#allocation25_spill] sm:$0xff] %v2546_v27  ;;  %v858_v40 = vmul.f32 %v2530_v21, %v826_v20  ;;  %v1773_v45 = vpop.eup %1772  ;;  %v984_v49 = vmul.f32 %v2507_v7, %v952_v3  ;;  %v605_v1 = vand.u32 2147483647, %v2546_v27 }
 0x161   : > { %v921_v53 = vmul.f32 %v2524_v48, %v889_v63  ;;  %v1269_v2 = vmul.f32 %v1765_v9, %v1045_v37  ;;  %1782 = vpow2.f32 %v1228_v34  ;;  %v1179_v22 = vsub.f32 0.0, %v1147_v52 }
 0x162   : > { %v890_v31 = vadd.f32 1.4214138, %v858_v40  ;;  %v1270_v13 = vmul.f32 %v1771_v39, %v1046_v11  ;;  %v637_v15 = vmul.f32 0.70710677, %v605_v1  ;;  %v2560_v50 = vadd.f32 %v2315_v57, %v352_v25 }
 0x163   : > { %v2555_v41 = vpop.eup %1774  ;;  %v953_v12 = vadd.f32 -0.28449672, %v921_v53  ;;  %v1015_v19 = vadd.f32 0.2548296, %v983_v8  ;;  %v3020_v9 = vand.u32 2147483647, %v2489_v36  ;;  %v1148_v20 = vmul.f32 %v2520_v38, %v2520_v38 }
 0x164   : > { %v1777_v24 = vpop.eup %1776  ;;  %v922_v63 = vmul.f32 %v2530_v21, %v890_v31  ;;  %v795_v3 = vmul.f32 1.0614054, %v2555_v41  ;;  %v3021_v37 = vmax.f32 %v2297_v17, 0.0  ;;  %v1016_v39 = vadd.f32 0.2548296, %v984_v49 }
 0x165   : > { %v2566_v34 = vmul.f32 0.5, %v3020_v9  ;;  %v669_v57 = vmul.f32 0.3275911, %v637_v15  ;;  %v1301_v52 = vmul.f32 %v1269_v2, %v2431_v10  ;;  %v985_v26 = vmul.f32 %v2524_v48, %v953_v12 }
 0x166   : > { %v2570_v11 = vsub.f32 %v3021_v37, %v1300_v47  ;;  %v827_v8 = vadd.f32 -1.4531521, %v795_v3  ;;  %v1230_v40 = vmul.f32 1.442695, %v1179_v22  ;;  %v2576_v53 = vpop.eup %1778  ;;  %v1302_v31 = vmul.f32 %v1270_v13, %v2468_v0 }
 0x167   : > { %v954_v9 = vadd.f32 -0.28449672, %v922_v63  ;;  %v701_v33 = vadd.f32 1.0, %v669_v57  ;;  %v606_v17 = vand.u32 2147483647, %v2560_v50  ;;  %v1047_v47 = vmul.f32 %v2503_v59, %v1015_v19 }
 0x168   : > { %3022 = vst [vmem:[#allocation26_spill] sm:$0xff] %v2570_v11  ;;  %v859_v49 = vmul.f32 %v2555_v41, %v827_v8  ;;  %v796_v38 = vmul.f32 1.0614054, %v2576_v53  ;;  %v1048_v2 = vmul.f32 %v2507_v7, %v1016_v39  ;;  %v3023_v22 = vand.u32 2147483647, %v2498_v55 }
 0x169   : > { %v1180_v3 = vsub.f32 0.0, %v1148_v20  ;;  %1784 = vrcp.f32 %v701_v33  ;;  %v1781_v0 = vpop.eup %1780  ;;  %v1017_v13 = vadd.f32 0.2548296, %v985_v26  ;;  %v3024_v59 = vmax.f32 %v2358_v46, 0.0 }
 0x16a   : > { %v2587_v12 = vmul.f32 0.5, %v3023_v22  ;;  %v891_v63 = vadd.f32 1.4214138, %v859_v49  ;;  %1786 = vpow2.f32 %v1230_v40  ;;  %v828_v37 = vadd.f32 -1.4531521, %v796_v38  ;;  %v357_v38 = vpop.permute.xlu0 %356 }
 0x16b   : > { %v2591_v19 = vsub.f32 %v3024_v59, %v1301_v52  ;;  %v3025_v57 = vmax.f32 %v2366_v29, 0.0  ;;  %v986_v7 = vmul.f32 %v2530_v21, %v954_v9  ;;  %v638_v39 = vmul.f32 0.70710677, %v606_v17  ;;  %v1783_v20 = vpop.eup %1782 }
 0x16c   : > { %v1271_v33 = vmul.f32 %v1773_v45, %v1047_v47  ;;  %v923_v26 = vmul.f32 %v2555_v41, %v891_v63  ;;  %v860_v40 = vmul.f32 %v2576_v53, %v828_v37  ;;  %v1149_v49 = vmul.f32 %v637_v15, %v637_v15 }
 0x16d   : > { %v2595_v8 = vsub.f32 %v3025_v57, %v1302_v31  ;;  %v1272_v46 = vmul.f32 %v1777_v24, %v1048_v2  ;;  %v1232_v52 = vmul.f32 1.442695, %v1180_v3  ;;  %v670_v22 = vmul.f32 0.3275911, %v638_v39  ;;  %v3027_v57 = vld [vmem:[#allocation21_spill] sm:$0xff] }
 0x16e   : > { %v2603_v29 = vadd.f32 %v2321_v62, %v352_v25  ;;  %v1049_v31 = vmul.f32 %v2524_v48, %v1017_v13  ;;  %v955_v9 = vadd.f32 -0.28449672, %v923_v26  ;;  %v892_v59 = vadd.f32 1.4214138, %v860_v40 }
 0x16f   : > { %3026 = vst [vmem:[#allocation27_spill] sm:$0xff] %v2595_v8  ;;  %v2607_v10 = vadd.f32 %v3027_v57, %v357_v38  ;;  %v1018_v45 = vadd.f32 0.2548296, %v986_v7  ;;  %v702_v63 = vadd.f32 1.0, %v670_v22  ;;  %v1303_v24 = vmul.f32 %v1271_v33, %v2478_v35 }
 0x170   : > { %v607_v15 = vand.u32 2147483647, %v2603_v29  ;;  %v987_v2 = vmul.f32 %v2555_v41, %v955_v9  ;;  %v924_v62 = vmul.f32 %v2576_v53, %v892_v59  ;;  %v1181_v25 = vsub.f32 0.0, %v1149_v49 }
 0x171   : > { %3028 = vst [vmem:[#allocation21_spill] sm:$0xff] %v2607_v10  ;;  %v2616_v48 = vmul.f32 0.5, %v605_v1  ;;  %1788 = vrcp.f32 %v702_v63  ;;  %v1150_v3 = vmul.f32 %v638_v39, %v638_v39  ;;  %v1304_v37 = vmul.f32 %v1272_v46, %v2494_v6  ;;  %v3030_v63 = vld [vmem:[#allocation22_spill] sm:$0xff] }
 0x172   : > { %v639_v13 = vmul.f32 0.70710677, %v607_v15  ;;  %v1273_v7 = vmul.f32 %v1781_v0, %v1049_v31  ;;  %v956_v26 = vadd.f32 -0.28449672, %v924_v62  ;;  %v608_v40 = vand.u32 2147483647, %v2607_v10 }
 0x173   : > { %v2620_v22 = vpop.eup %1784  ;;  %v1050_v35 = vmul.f32 %v2530_v21, %v1018_v45  ;;  %v1019_v33 = vadd.f32 0.2548296, %v987_v2  ;;  %1790 = vpow2.f32 %v1232_v52  ;;  %v3029_v1 = vmax.f32 %v2392_v30, 0.0 }
 0x174   : > { %v671_v49 = vmul.f32 0.3275911, %v639_v13  ;;  %v1787_v9 = vpop.eup %1786  ;;  %v797_v39 = vmul.f32 1.0614054, %v2620_v22  ;;  %v1234_v57 = vmul.f32 1.442695, %v1181_v25  ;;  %v1151_v31 = vmul.f32 %v639_v13, %v639_v13 }
 0x175   : > { %v2625_v59 = vsub.f32 %v3029_v1, %v1303_v24  ;;  %v640_v6 = vmul.f32 0.70710677, %v608_v40  ;;  %v1182_v0 = vsub.f32 0.0, %v1150_v3  ;;  %v2631_v62 = vadd.f32 %v3030_v63, %v357_v38  ;;  %v362_v1 = vpop.permute.xlu1 %361 }
 0x176   : > { %v703_v46 = vadd.f32 1.0, %v671_v49  ;;  %v3032_v21 = vmax.f32 %v2403_v42, 0.0  ;;  %v1305_v30 = vmul.f32 %v1273_v7, %v2515_v23  ;;  %v988_v45 = vmul.f32 %v2576_v53, %v956_v26 }
 0x177   : > { %3031 = vst [vmem:[#allocation22_spill] sm:$0xff] %v2631_v62  ;;  %v672_v24 = vmul.f32 0.3275911, %v640_v6  ;;  %v1274_v2 = vmul.f32 %v1783_v20, %v1050_v35  ;;  %v1051_v25 = vmul.f32 %v2555_v41, %v1019_v33  ;;  %v609_v3 = vand.u32 2147483647, %v2631_v62 }
 0x178   : > { %v2635_v52 = vsub.f32 %v3032_v21, %v1304_v37  ;;  %1792 = vrcp.f32 %v703_v46  ;;  %v829_v49 = vadd.f32 -1.4531521, %v797_v39  ;;  %v2644_v42 = vmul.f32 0.5, %v606_v17 }
 0x179   : > { %1794 = vpow2.f32 %v1234_v57  ;;  %v704_v13 = vadd.f32 1.0, %v672_v24  ;;  %v1236_v37 = vmul.f32 1.442695, %v1182_v0  ;;  %v1183_v23 = vsub.f32 0.0, %v1151_v31 }
 0x17a   : > { %3033 = vst [vmem:[#allocation28_spill] sm:$0xff] %v2635_v52  ;;  %v641_v7 = vmul.f32 0.70710677, %v609_v3  ;;  %v3034_v26 = vmax.f32 %v2442_v60, 0.0  ;;  %v1020_v41 = vadd.f32 0.2548296, %v988_v45  ;;  %v1152_v35 = vmul.f32 %v640_v6, %v640_v6 }
 0x17b   : > { %1796 = vrcp.f32 %v704_v13  ;;  %v2650_v33 = vpop.eup %1788  ;;  %v1306_v39 = vmul.f32 %v1274_v2, %v2542_v56  ;;  %v1275_v57 = vmul.f32 %v1787_v9, %v1051_v25  ;;  %v861_v0 = vmul.f32 %v2620_v22, %v829_v49 }
 0x17c   : > { %v2648_v20 = vsub.f32 %v3034_v26, %v1305_v30  ;;  %v673_v17 = vmul.f32 0.3275911, %v641_v7  ;;  %v798_v31 = vmul.f32 1.0614054, %v2650_v33  ;;  %v2656_v63 = vmul.f32 0.5, %v607_v15 }
 0x17d   : > { %v2659_v60 = vadd.f32 %v2346_v5, %v362_v1  ;;  %v1791_v21 = vpop.eup %1790  ;;  %1798 = vpow2.f32 %v1236_v37  ;;  %v1238_v6 = vmul.f32 1.442695, %v1183_v23  ;;  %v2662_v45 = vadd.f32 %v2349_v14, %v362_v1 }
 0x17e   : > { %3035 = vst [vmem:[#allocation29_spill] sm:$0xff] %v2648_v20  ;;  %v705_v30 = vadd.f32 1.0, %v673_v17  ;;  %v1052_v56 = vmul.f32 %v2576_v53, %v1020_v41  ;;  %v830_v9 = vadd.f32 -1.4531521, %v798_v31  ;;  %v1184_v24 = vsub.f32 0.0, %v1152_v35  ;;  %v3040_v53 = vld [vmem:[#allocation14_spill] sm:$0xff] }
 0x17f   : > { %v610_v2 = vand.u32 2147483647, %v2659_v60  ;;  %v3036_v25 = vmax.f32 %v2445_v18, 0.0  ;;  %v1307_v5 = vmul.f32 %v1275_v57, %v2566_v34  ;;  %v611_v49 = vand.u32 2147483647, %v2662_v45  ;;  %v3045_v20 = vld [vmem:[#allocation17_spill] sm:$0xff] }
 0x180   : > { %1800 = vrcp.f32 %v705_v30  ;;  %v893_v13 = vadd.f32 1.4214138, %v861_v0  ;;  %v862_v37 = vmul.f32 %v2650_v33, %v830_v9  ;;  %v1153_v14 = vmul.f32 %v641_v7, %v641_v7 }
 0x181   : > { %v2668_v15 = vsub.f32 %v3036_v25, %v1306_v39  ;;  %v642_v23 = vmul.f32 0.70710677, %v610_v2  ;;  %1802 = vpow2.f32 %v1238_v6  ;;  %v2678_v18 = vmul.f32 0.5, %v608_v40 }
 0x182   : > { %v2673_v26 = vpop.eup %1792  ;;  %v643_v41 = vmul.f32 0.70710677, %v611_v49  ;;  %v1276_v34 = vmul.f32 %v1791_v21, %v1052_v56  ;;  %v894_v1 = vadd.f32 1.4214138, %v862_v37  ;;  %v1240_v57 = vmul.f32 1.442695, %v1184_v24 }
 0x183   : > { %3037 = vst [vmem:[#allocation30_spill] sm:$0xff] %v2668_v15  ;;  %v2680_v35 = vpop.eup %1794  ;;  %v799_v39 = vmul.f32 1.0614054, %v2673_v26  ;;  %v3038_v7 = vmax.f32 %v2489_v36, 0.0  ;;  %v674_v31 = vmul.f32 0.3275911, %v642_v23  ;;  %v925_v40 = vmul.f32 %v2620_v22, %v893_v13 }
 0x184   : > { %v675_v6 = vmul.f32 0.3275911, %v643_v41  ;;  %v2691_v25 = vmul.f32 0.5, %v609_v3  ;;  %v1185_v21 = vsub.f32 0.0, %v1153_v14  ;;  %v777_v36 = vmul.f32 1.0614054, %v3040_v53 }
 0x185   : > { %v2685_v17 = vsub.f32 %v3038_v7, %v1307_v5  ;;  %v2688_v30 = vpop.eup %1796  ;;  %v831_v9 = vadd.f32 -1.4531521, %v799_v39  ;;  %v706_v37 = vadd.f32 1.0, %v674_v31  ;;  %v1308_v5 = vmul.f32 %v1276_v34, %v2587_v12  ;;  %v3041_v3 = vld [vmem:[#allocation18_spill] sm:$0xff] }
 0x186   : > { %v800_v56 = vmul.f32 1.0614054, %v2688_v30  ;;  %v707_v24 = vadd.f32 1.0, %v675_v6  ;;  %v926_v7 = vmul.f32 %v2650_v33, %v894_v1  ;;  %1804 = vpow2.f32 %v1240_v57 }
 0x187   : > { %3039 = vst [vmem:[#allocation31_spill] sm:$0xff] %v2685_v17  ;;  %v1154_v0 = vmul.f32 %v642_v23, %v642_v23  ;;  %v2697_v47 = vpop.eup %1798  ;;  %v863_v13 = vmul.f32 %v2673_v26, %v831_v9  ;;  %1806 = vrcp.f32 %v706_v37  ;;  %v779_v14 = vmul.f32 1.0614054, %v3041_v3 }
 0x188   : > { %v832_v39 = vadd.f32 -1.4531521, %v800_v56  ;;  %v957_v46 = vadd.f32 -0.28449672, %v925_v40  ;;  %v1242_v38 = vmul.f32 1.442695, %v1185_v21  ;;  %1808 = vrcp.f32 %v707_v24 }
 0x189   : > { %v2702_v6 = vmul.f32 0.5, %v610_v2  ;;  %v809_v23 = vadd.f32 -1.4531521, %v777_v36  ;;  %v811_v34 = vadd.f32 -1.4531521, %v779_v14  ;;  %v2708_v9 = vmul.f32 0.5, %v611_v49 }
 0x18a   : > { %v2704_v15 = vpop.eup %1800  ;;  %v864_v12 = vmul.f32 %v2688_v30, %v832_v39  ;;  %v958_v1 = vadd.f32 -0.28449672, %v926_v7  ;;  %v1155_v56 = vmul.f32 %v643_v41, %v643_v41  ;;  %v895_v40 = vadd.f32 1.4214138, %v863_v13  ;;  %v3042_v36 = vld [vmem:[#allocation13_spill] sm:$0xff] }
 0x18b   : > { %v801_v57 = vmul.f32 1.0614054, %v2704_v15  ;;  %v2710_v37 = vpop.eup %1802  ;;  %v1186_v21 = vsub.f32 0.0, %v1154_v0  ;;  %v841_v2 = vmul.f32 %v3040_v53, %v809_v23  ;;  %v843_v31 = vmul.f32 %v3041_v3, %v811_v34 }
 0x18c   : > { %v989_v52 = vmul.f32 %v2620_v22, %v957_v46  ;;  %v896_v39 = vadd.f32 1.4214138, %v864_v12  ;;  %v776_v14 = vmul.f32 1.0614054, %v3042_v36  ;;  %v3043_v7 = vmax.f32 %v2498_v55, 0.0 }
 0x18d   : > { %v833_v24 = vadd.f32 -1.4531521, %v801_v57  ;;  %v873_v49 = vadd.f32 1.4214138, %v841_v2  ;;  %v875_v41 = vadd.f32 1.4214138, %v843_v31  ;;  %v990_v0 = vmul.f32 %v2650_v33, %v958_v1 }
 0x18e   : > { %v2718_v17 = vsub.f32 %v3043_v7, %v1308_v5  ;;  %v778_v62 = vmul.f32 1.0614054, %v3045_v20  ;;  %v1187_v23 = vsub.f32 0.0, %v1155_v56  ;;  %v808_v34 = vadd.f32 -1.4531521, %v776_v14 }
 0x18f   : > { %v865_v13 = vmul.f32 %v2704_v15, %v833_v24  ;;  %v927_v46 = vmul.f32 %v2673_v26, %v895_v40  ;;  %v905_v12 = vmul.f32 %v3040_v53, %v873_v49  ;;  %v907_v57 = vmul.f32 %v3041_v3, %v875_v41 }
 0x190   : > { %3044 = vst [vmem:[#allocation14_spill] sm:$0xff] %v2718_v17  ;;  %v810_v8 = vadd.f32 -1.4531521, %v778_v62  ;;  %v2726_v55 = vpop.eup %1804  ;;  %v1021_v5 = vadd.f32 0.2548296, %v989_v52  ;;  %v928_v31 = vmul.f32 %v2688_v30, %v896_v39  ;;  %v840_v7 = vmul.f32 %v3042_v36, %v808_v34 }
 0x191   : > { %v897_v2 = vadd.f32 1.4214138, %v865_v13  ;;  %v2730_v1 = vpop.eup %1806  ;;  %v1244_v24 = vmul.f32 1.442695, %v1186_v21  ;;  %v937_v56 = vadd.f32 -0.28449672, %v905_v12  ;;  %1810 = vpow2.f32 %v1242_v38 }
 0x192   : > { %v939_v14 = vadd.f32 -0.28449672, %v907_v57  ;;  %v842_v40 = vmul.f32 %v3045_v20, %v810_v8  ;;  %v1022_v17 = vadd.f32 0.2548296, %v990_v0  ;;  %v802_v62 = vmul.f32 1.0614054, %v2730_v1  ;;  %v2735_v11 = vpop.eup %1808 }
 0x193   : > { %v929_v49 = vmul.f32 %v2704_v15, %v897_v2  ;;  %v1246_v41 = vmul.f32 1.442695, %v1187_v23  ;;  %v959_v52 = vadd.f32 -0.28449672, %v927_v46  ;;  %v969_v39 = vmul.f32 %v3040_v53, %v937_v56 }
 0x194   : > { %v971_v13 = vmul.f32 %v3041_v3, %v939_v14  ;;  %v872_v34 = vadd.f32 1.4214138, %v840_v7  ;;  %v960_v10 = vadd.f32 -0.28449672, %v928_v31  ;;  %v834_v21 = vadd.f32 -1.4531521, %v802_v62 }
 0x195   : > { %v803_v12 = vmul.f32 1.0614054, %v2735_v11  ;;  %v2741_v8 = vmul.f32 %v2620_v22, %v1021_v5  ;;  %v1001_v0 = vadd.f32 0.2548296, %v969_v39  ;;  %v874_v2 = vadd.f32 1.4214138, %v842_v40 }
 0x196   : > { %v1003_v57 = vadd.f32 0.2548296, %v971_v13  ;;  %v961_v23 = vadd.f32 -0.28449672, %v929_v49  ;;  %v866_v27 = vmul.f32 %v2730_v1, %v834_v21  ;;  %1812 = vpow2.f32 %v1244_v24  ;;  %v3046_v49 = vld [vmem:[#allocation16_spill] sm:$0xff] }
 0x197   : > { %v835_v46 = vadd.f32 -1.4531521, %v803_v12  ;;  %v991_v56 = vmul.f32 %v2673_v26, %v959_v52  ;;  %v1033_v7 = vmul.f32 %v3040_v53, %v1001_v0  ;;  %v904_v31 = vmul.f32 %v3042_v36, %v872_v34  ;;  %v3047_v24 = vld [vmem:[#allocation20_spill] sm:$0xff] }
 0x198   : > { %v1035_v38 = vmul.f32 %v3041_v3, %v1003_v57  ;;  %v992_v14 = vmul.f32 %v2688_v30, %v960_v10  ;;  %v898_v22 = vadd.f32 1.4214138, %v866_v27  ;;  %1814 = vpow2.f32 %v1246_v41  ;;  %v3048_v10 = vld [vmem:[#allocation10_spill] sm:$0xff]  ;;  %v3049_v12 = vld [vmem:[#allocation12_spill] sm:$0xff]  ;;  %v367_v57 = vpop.permute.xlu0 %366 }
 0x199   : > { %v867_v5 = vmul.f32 %v2735_v11, %v835_v46  ;;  %v1054_v40 = vmul.f32 %v2650_v33, %v1022_v17  ;;  %v1257_v62 = vmul.f32 %v3046_v49, %v1033_v7  ;;  %v906_v52 = vmul.f32 %v3045_v20, %v874_v2  ;;  %v3050_v2 = vld [vmem:[#allocation6_spill] sm:$0xff]  ;;  %v3052_v49 = vld [vmem:[#allocation8_spill] sm:$0xff] }
 0x19a   : > { %v1259_v39 = vmul.f32 %v3047_v24, %v1035_v38  ;;  %v993_v53 = vmul.f32 %v2704_v15, %v961_v23  ;;  %v930_v3 = vmul.f32 %v2730_v1, %v898_v22  ;;  %v936_v34 = vadd.f32 -0.28449672, %v904_v31 }
 0x19b   : > { %v899_v13 = vadd.f32 1.4214138, %v867_v5  ;;  %v1023_v21 = vadd.f32 0.2548296, %v991_v56  ;;  %v1289_v27 = vmul.f32 %v1257_v62, %v3048_v10  ;;  %v938_v41 = vadd.f32 -0.28449672, %v906_v52  ;;  %v1811_v62 = vpop.eup %1810 }
 0x19c   : > { %v1291_v0 = vmul.f32 %v1259_v39, %v3049_v12  ;;  %v1024_v33 = vadd.f32 0.2548296, %v992_v14  ;;  %v962_v17 = vadd.f32 -0.28449672, %v930_v3  ;;  %v968_v7 = vmul.f32 %v3042_v36, %v936_v34 }
 0x19d   : > { %v931_v46 = vmul.f32 %v2735_v11, %v899_v13  ;;  %v3051_v38 = vmax.f32 %v3050_v2, 0.0  ;;  %v3053_v22 = vmax.f32 %v3052_v49, 0.0  ;;  %v970_v56 = vmul.f32 %v3045_v20, %v938_v41  ;;  %v3054_v2 = vld [vmem:[#allocation15_spill] sm:$0xff] }
 0x19e   : > { %v2766_v31 = vadd.f32 %v2352_v43, %v367_v57  ;;  %v1025_v24 = vadd.f32 0.2548296, %v993_v53  ;;  %v994_v14 = vmul.f32 %v2730_v1, %v962_v17  ;;  %v1000_v52 = vadd.f32 0.2548296, %v968_v7 }
 0x19f   : > { %v1321_v23 = vsub.f32 %v3051_v38, %v1289_v27  ;;  %v1323_v5 = vsub.f32 %v3053_v22, %v1291_v0  ;;  %v963_v39 = vadd.f32 -0.28449672, %v931_v46  ;;  %v1055_v3 = vmul.f32 %v2673_v26, %v1023_v21  ;;  %v372_v38 = vpop.permute.xlu1 %371 }
 0x1a0   : > { %v1002_v34 = vadd.f32 0.2548296, %v970_v56  ;;  %v612_v10 = vand.u32 2147483647, %v2766_v31  ;;  %v1813_v27 = vpop.eup %1812  ;;  %v1278_v12 = vmul.f32 %v2697_v47, %v1054_v40  ;;  %v1026_v0 = vadd.f32 0.2548296, %v994_v14 }
 0x1a1   : > { %v1611_v13 = vpack.c.bf16 %v1323_v5, %v1321_v23  ;;  %v995_v41 = vmul.f32 %v2735_v11, %v963_v39  ;;  %v1032_v43 = vmul.f32 %v3042_v36, %v1000_v52  ;;  %v1056_v53 = vmul.f32 %v2688_v30, %v1024_v33  ;;  %v3055_v33 = vld [vmem:[#allocation19_spill] sm:$0xff] }
 0x1a2   : > { %v1034_v17 = vmul.f32 %v3045_v20, %v1002_v34  ;;  %v2778_v26 = vmul.f32 0.70710677, %v612_v10  ;;  %v2781_v21 = vadd.f32 %v2368_v54, %v367_v57  ;;  %v1815_v46 = vpop.eup %1814  ;;  %v1057_v47 = vmul.f32 %v2704_v15, %v1025_v24  ;;  %v3056_v57 = vld [vmem:[#allocation9_spill] sm:$0xff]  ;;  %v3057_v56 = vld [vmem:[#allocation11_spill] sm:$0xff] }
 0x1a3   : > { %1612 = vmatprep.subr.bf16.mxu1 %v1611_v13  ;;  %v1058_v40 = vmul.f32 %v2730_v1, %v1026_v0  ;;  %v1027_v7 = vadd.f32 0.2548296, %v995_v41  ;;  %v1256_v36 = vmul.f32 %v3054_v2, %v1032_v43  ;;  %v1279_v30 = vmul.f32 %v2710_v37, %v1055_v3  ;;  %v3058_v13 = vld [vmem:[#allocation5_spill] sm:$0xff] }
 0x1a4   : > { %v1258_v20 = vmul.f32 %v3055_v33, %v1034_v17  ;;  %v676_v23 = vmul.f32 0.3275911, %v2778_v26  ;;  %v613_v49 = vand.u32 2147483647, %v2781_v21  ;;  %v2793_v15 = vadd.f32 %v2375_v58, %v372_v38  ;;  %v3069_v33 = vld [vmem:[#allocation21_spill] sm:$0xff] }
 0x1a5   : > { %v1282_v22 = vmul.f32 %v1813_v27, %v1058_v40  ;;  %v1059_v54 = vmul.f32 %v2735_v11, %v1027_v7  ;;  %v1288_v5 = vmul.f32 %v1256_v36, %v3056_v57  ;;  %v1277_v1 = vmul.f32 %v2680_v35, %v2741_v8  ;;  %v3060_v27 = vld [vmem:[#allocation7_spill] sm:$0xff]  ;;  %v3073_v57 = vld [vmem:[#allocation22_spill] sm:$0xff] }
 0x1a6   : > { %v1290_v24 = vmul.f32 %v1258_v20, %v3057_v56  ;;  %v708_v37 = vadd.f32 1.0, %v676_v23  ;;  %v2800_v14 = vmul.f32 0.70710677, %v613_v49  ;;  %v1310_v39 = vmul.f32 %v1278_v12, %v2644_v42 }
 0x1a7   : > { %v1280_v52 = vmul.f32 %v2726_v55, %v1056_v53  ;;  %v1281_v11 = vmul.f32 %v1811_v62, %v1057_v47  ;;  %v1283_v3 = vmul.f32 %v1815_v46, %v1059_v54  ;;  %v3059_v34 = vmax.f32 %v3058_v13, 0.0 }
 0x1a8   : > { %v3061_v0 = vmax.f32 %v3060_v27, 0.0  ;;  %1816 = vrcp.f32 %v708_v37  ;;  %v677_v35 = vmul.f32 0.3275911, %v2800_v14  ;;  %v1311_v8 = vmul.f32 %v1279_v30, %v2656_v63  ;;  %v3077_v37 = vld [vmem:[#allocation28_spill] sm:$0xff] }
 0x1a9   : > { %v1320_v58 = vsub.f32 %v3059_v34, %v1288_v5  ;;  %v1314_v43 = vmul.f32 %v1282_v22, %v2702_v6  ;;  %v1091_v17 = vmax.f32 %v2662_v45, 0.0  ;;  %v614_v42 = vand.u32 2147483647, %v2793_v15 }
 0x1aa   : > { %v1322_v41 = vsub.f32 %v3061_v0, %v1290_v24  ;;  %v1309_v55 = vmul.f32 %v1277_v1, %v2616_v48  ;;  %v1315_v62 = vmul.f32 %v1283_v3, %v2708_v9  ;;  %v709_v53 = vadd.f32 1.0, %v677_v35  ;;  %v3075_v24 = vld [vmem:[#allocation29_spill] sm:$0xff]  ;;  %v3079_v3 = vld [vmem:[#allocation14_spill] sm:$0xff] }
 0x1ab   : > { %v3062_v46 = vmax.f32 %v2560_v50, 0.0  ;;  %v1312_v40 = vmul.f32 %v1280_v52, %v2678_v18  ;;  %v1313_v63 = vmul.f32 %v1281_v11, %v2691_v25  ;;  %v646_v6 = vmul.f32 0.70710677, %v614_v42 }
 0x1ac   : > { %v1613_v12 = vpack.c.bf16 %v1322_v41, %v1320_v58  ;;  %1818 = vrcp.f32 %v709_v53  ;;  %v2824_v45 = vadd.f32 %v2380_v32, %v372_v38  ;;  %v1615_v48 = vpack.c.bf16 %v2419_v51, %v2407_v61  ;;  %v3065_v61 = vld [vmem:[#allocation23_spill] sm:$0xff]  ;;  %v3066_v51 = vld [vmem:[#allocation24_spill] sm:$0xff] }
 0x1ad   : > { %v2817_v47 = vsub.f32 %v3062_v46, %v1310_v39  ;;  %v1617_v50 = vpack.c.bf16 %v2415_v16, %v2400_v4  ;;  %v3063_v9 = vmax.f32 %v2603_v29, 0.0  ;;  %v3064_v18 = vmax.f32 %v2659_v60, 0.0  ;;  %v3067_v16 = vld [vmem:[#allocation25_spill] sm:$0xff]  ;;  %v3078_v39 = vld [vmem:[#allocation30_spill] sm:$0xff] }
 0x1ae   : > { %1614 = vmatpush1.bf16.msra.mxu1 %v1613_v12  ;;  %v678_v2 = vmul.f32 0.3275911, %v646_v6  ;;  %v1619_v36 = vpack.c.bf16 %v2486_v28, %v2449_v44  ;;  %v2838_v30 = vsub.f32 %v1091_v17, %v1315_v62  ;;  %v615_v32 = vand.u32 2147483647, %v2824_v45  ;;  %v3071_v44 = vld [vmem:[#allocation26_spill] sm:$0xff]  ;;  %v3072_v28 = vld [vmem:[#allocation27_spill] sm:$0xff] }
 0x1af   : > { %v1343_v7 = vsub.f32 %v3063_v9, %v1311_v8  ;;  %v2834_v25 = vsub.f32 %v3064_v18, %v1314_v43  ;;  %1616 = vmatprep.subr.bf16.mxu1 %v1615_v48  ;;  %v1621_v38 = vpack.c.bf16 %v3066_v51, %v3065_v61  ;;  %v1623_v4 = vpack.c.bf16 %v2625_v59, %v2591_v19  ;;  %v3076_v19 = vld [vmem:[#allocation31_spill] sm:$0xff] }
 0x1b0   : > { %v3068_v29 = vmax.f32 %v3067_v16, 0.0  ;;  %v3070_v20 = vmax.f32 %v3069_v33, 0.0  ;;  %v710_v22 = vadd.f32 1.0, %v678_v2  ;;  %v1625_v54 = vpack.c.bf16 %v3072_v28, %v3071_v44 }
 0x1b1   : > { %v3074_v5 = vmax.f32 %v3073_v57, 0.0  ;;  %v647_v56 = vmul.f32 0.70710677, %v615_v32  ;;  %v1627_v59 = vpack.c.bf16 %v3076_v19, %v3075_v24  ;;  %v1629_v52 = vpack.c.bf16 %v3078_v39, %v3077_v37 }
 0x1b2   : > { %v1341_v60 = vsub.f32 %v3068_v29, %v1309_v55  ;;  %v2849_v23 = vsub.f32 %v3070_v20, %v1312_v40  ;;  %1618 = vmatpush1.bf16.msra.mxu1 %v1617_v50  ;;  %1820 = vrcp.f32 %v710_v22  ;;  %v1633_v13 = vpack.c.bf16 %v2817_v47, %v3079_v3  ;;  %v1817_v34 = vpop.eup %1816 }
 0x1b3   : > { %v1345_v1 = vsub.f32 %v3074_v5, %v1313_v63  ;;  %1620 = vmatprep.subr.bf16.mxu1 %v1619_v36  ;;  %v679_v58 = vmul.f32 0.3275911, %v647_v56  ;;  %v804_v41 = vmul.f32 1.0614054, %v1817_v34  ;;  %v1156_v35 = vmul.f32 %v2778_v26, %v2778_v26 }
 0x1b4   : > { %v1631_v11 = vpack.c.bf16 %v1343_v7, %v1341_v60  ;;  %v1637_v0 = vpack.c.bf16 %v2834_v25, %v2849_v23  ;;  %v1158_v53 = vmul.f32 %v646_v6, %v646_v6  ;;  %v1157_v46 = vmul.f32 %v2800_v14, %v2800_v14 }
 0x1b5   : > { %v1635_v27 = vpack.c.bf16 %v2838_v30, %v1345_v1  ;;  %v711_v8 = vadd.f32 1.0, %v679_v58  ;;  %v836_v43 = vadd.f32 -1.4531521, %v804_v41  ;;  %v1188_v62 = vsub.f32 0.0, %v1156_v35 }
 0x1b6   : > { %1622 = vmatpush1.bf16.msra.mxu1 %v1621_v38  ;;  %v1819_v17 = vpop.eup %1818  ;;  %v1190_v9 = vsub.f32 0.0, %v1158_v53  ;;  %v1189_v7 = vsub.f32 0.0, %v1157_v46  ;;  %v1159_v25 = vmul.f32 %v647_v56, %v647_v56  ;;  %v1124_v3 = vmul.f32 0.5, %v612_v10 }
 0x1b7   : > { %1624 = vmatprep.subr.bf16.mxu1 %v1623_v4  ;;  %1822 = vrcp.f32 %v711_v8  ;;  %v868_v55 = vmul.f32 %v1817_v34, %v836_v43  ;;  %v805_v12 = vmul.f32 1.0614054, %v1819_v17  ;;  %v1248_v26 = vmul.f32 1.442695, %v1188_v62 }
 0x1b8   : > { %v1252_v61 = vmul.f32 1.442695, %v1190_v9  ;;  %v1250_v38 = vmul.f32 1.442695, %v1189_v7  ;;  %v1191_v16 = vsub.f32 0.0, %v1159_v25  ;;  %v1094_v62 = vmax.f32 %v2793_v15, 0.0  ;;  %v1363_v25 = vpop.permute.xlu0 %1362 }
 0x1b9   : > { %v900_v47 = vadd.f32 1.4214138, %v868_v55  ;;  %v837_v40 = vadd.f32 -1.4531521, %v805_v12  ;;  %1824 = vpow2.f32 %v1248_v26  ;;  %v1092_v55 = vmax.f32 %v2766_v31, 0.0  ;;  %v1352_v7 = vld [vmem:[%s2959_s3] sm:$0xff] }
 0x1ba   : > { %1626 = vmatpush1.bf16.msra.mxu1 %v1625_v54  ;;  %1826 = vpow2.f32 %v1252_v61  ;;  %v1254_v28 = vmul.f32 1.442695, %v1191_v16  ;;  %v1125_v12 = vmul.f32 0.5, %v613_v49  ;;  %v1093_v26 = vmax.f32 %v2781_v21, 0.0  ;;  %v1353_v21 = vld [vmem:[%s2959_s3 + $0x8] sm:$0xff] }
 0x1bb   : > { %1628 = vmatprep.subr.bf16.mxu1 %v1627_v59  ;;  %v932_v48 = vmul.f32 %v1817_v34, %v900_v47  ;;  %v869_v50 = vmul.f32 %v1819_v17, %v837_v40  ;;  %1828 = vpow2.f32 %v1250_v38  ;;  %v1095_v31 = vmax.f32 %v2824_v45, 0.0  ;;  %v1354_v45 = vld [vmem:[%s2959_s3 + $0x10] sm:$0xff] }
 0x1bc   : > { %v1821_v63 = vpop.eup %1820  ;;  %1830 = vpow2.f32 %v1254_v28  ;;  %v1373_v16 = vpop.permute.xlu0 %1372 }
 0x1bd   : > { %v806_v18 = vmul.f32 1.0614054, %v1821_v63  ;;  %v964_v2 = vadd.f32 -0.28449672, %v932_v48  ;;  %v901_v36 = vadd.f32 1.4214138, %v869_v50 }
 0x1be   : > { %1630 = vmatpush1.bf16.msra.mxu1 %v1629_v52 }
 0x1bf   : > { %1632 = vmatprep.subr.bf16.mxu1 %v1631_v11  ;;  %v838_v6 = vadd.f32 -1.4531521, %v806_v18  ;;  %v996_v30 = vmul.f32 %v1817_v34, %v964_v2  ;;  %v933_v14 = vmul.f32 %v1819_v17, %v901_v36  ;;  %v1355_v18 = vld [vmem:[%s2959_s3 + $0x18] sm:$0xff] }
 0x1c1   : > { %v1823_v51 = vpop.eup %1822  ;;  %v870_v4 = vmul.f32 %v1821_v63, %v838_v6  ;;  %v965_v29 = vadd.f32 -0.28449672, %v933_v14  ;;  %v1028_v33 = vadd.f32 0.2548296, %v996_v30  ;;  %v1368_v14 = vpop.permute.xlu1 %1367 }
 0x1c2   : > { %1634 = vmatpush1.bf16.msra.mxu1 %v1633_v13  ;;  %v807_v60 = vmul.f32 1.0614054, %v1823_v51 }
 0x1c3   : > { %1636 = vmatprep.subr.bf16.mxu1 %v1635_v27  ;;  %v902_v20 = vadd.f32 1.4214138, %v870_v4  ;;  %v997_v23 = vmul.f32 %v1819_v17, %v965_v29  ;;  %v1060_v57 = vmul.f32 %v1817_v34, %v1028_v33  ;;  %v1825_v19 = vpop.eup %1824  ;;  %v1126_v34 = vmul.f32 0.5, %v614_v42 }
 0x1c4   : > { %v839_v22 = vadd.f32 -1.4531521, %v807_v60  ;;  %v1827_v58 = vpop.eup %1826 }
 0x1c5   : > { %v934_v44 = vmul.f32 %v1821_v63, %v902_v20  ;;  %v1029_v1 = vadd.f32 0.2548296, %v997_v23  ;;  %v1284_v37 = vmul.f32 %v1825_v19, %v1060_v57  ;;  %v1378_v23 = vpop.permute.xlu1 %1377 }
 0x1c6   : > { %1638 = vmatpush1.bf16.msra.mxu1 %v1637_v0  ;;  %v871_v54 = vmul.f32 %v1823_v51, %v839_v22  ;;  %v1829_v0 = vpop.eup %1828 }
 0x1c7   : > { %v966_v5 = vadd.f32 -0.28449672, %v934_v44  ;;  %v1061_v52 = vmul.f32 %v1819_v17, %v1029_v1  ;;  %v1316_v41 = vmul.f32 %v1284_v37, %v1124_v3  ;;  %v1831_v53 = vpop.eup %1830 }
 0x1c8   : > { %v903_v56 = vadd.f32 1.4214138, %v871_v54 }
 0x1c9   : > { %v998_v24 = vmul.f32 %v1821_v63, %v966_v5  ;;  %v1285_v8 = vmul.f32 %v1829_v0, %v1061_v52  ;;  %v1348_v46 = vsub.f32 %v1092_v55, %v1316_v41 }
 0x1ca   : > { %v935_v59 = vmul.f32 %v1823_v51, %v903_v56 }
 0x1cb   : > { %v1030_v39 = vadd.f32 0.2548296, %v998_v24  ;;  %v1317_v40 = vmul.f32 %v1285_v8, %v1125_v12 }
 0x1cc   : > { %v967_v11 = vadd.f32 -0.28449672, %v935_v59 }
 0x1cd   : > { %v1062_v13 = vmul.f32 %v1821_v63, %v1030_v39  ;;  %v1127_v63 = vmul.f32 0.5, %v615_v32  ;;  %v1349_v15 = vsub.f32 %v1093_v26, %v1317_v40  ;;  %v3080_v32 = vmov 0.0  }
 0x1ce   : > { %v999_v27 = vmul.f32 %v1823_v51, %v967_v11 }
 0x1cf   : > { %v1286_v35 = vmul.f32 %v1827_v58, %v1062_v13 }
 0x1d0   : > { %v1031_v43 = vadd.f32 0.2548296, %v999_v27 }
 0x1d1   : > { %v1318_v17 = vmul.f32 %v1286_v35, %v1126_v34 }
 0x1d2   : > { %v1063_v10 = vmul.f32 %v1823_v51, %v1031_v43 }
 0x1d3   : > { %v1350_v47 = vsub.f32 %v1094_v62, %v1318_v17 }
 0x1d4   : > { %v1287_v42 = vmul.f32 %v1831_v53, %v1063_v10 }
 0x1d5   : > { %v1641_v48 = vpack.c.bf16 %v1350_v47, %v1348_v46 }
 0x1d6   : > { %v1319_v50 = vmul.f32 %v1287_v42, %v1127_v63 }
 0x1d8   : > { %v1351_v9 = vsub.f32 %v1095_v31, %v1319_v50 }
 0x1da   : > { %v1639_v49 = vpack.c.bf16 %v1351_v9, %v1349_v15 }
 0x1dc   : > { %1640 = vmatprep.subr.bf16.mxu1 %v1639_v49 }
 0x1dd   : > { %1642 = vmatpush1.bf16.msra.mxu1 %v1641_v48 }
 0x1e0   : > { %1445 = vmatmul.mubr.f32.vlgmr.msra.gmra.mrb[0].mxu1 %v1352_v7 }
 0x1e1   : > { %1450 = vmatprep.mubr.f32.mxu1 %v3080_v32 }
 0x1e4   : > { %1451 = vmatmul.mubr.f32.gmra.mrb[2].mxu1 %v1353_v21 }
 0x1e5   : > { %1456 = vmatprep.mubr.f32.mxu1 %v3080_v32 }
 0x1e8   : > { %1457 = vmatmul.mubr.f32.gmra.mrb[4].mxu1 %v1354_v45 }
 0x1e9   : > { %1462 = vmatprep.mubr.f32.mxu1 %v3080_v32 }
 0x1ec   : > { %1463 = vmatmul.mubr.f32.gmra.mrb[6].mxu1 %v1355_v18 }
 0x2b3   : > { %v1446_v2 = vpop.f32.mrb[0].mxu1 }
 0x2b4   : > { %v1447_v36 = vadd.f32 %v1446_v2, %v1363_v25  ;;  %v1448_v6 = vpop.f32.mrb[1].mxu1 }
 0x2b5   : > { %v1449_v30 = vadd.f32 %v1448_v6, %v1363_v25 }
 0x2b6   : > { %1469 = vst [vmem:[%s242_s25] sm:$0xff] %v1447_v36 }
 0x2b7   : > { %1470 = vst [vmem:[%s242_s25 + $0x8] sm:$0xff] %v1449_v30  ;;  %v1452_v61 = vpop.f32.mrb[2].mxu1 }
 0x2b8   : > { %v1453_v51 = vadd.f32 %v1452_v61, %v1368_v14  ;;  %v1454_v38 = vpop.f32.mrb[3].mxu1 }
 0x2b9   : > { %v1455_v4 = vadd.f32 %v1454_v38, %v1368_v14 }
 0x2ba   : > { %1471 = vst [vmem:[%s242_s25 + $0x10] sm:$0xff] %v1453_v51 }
 0x2bb   : > { %1472 = vst [vmem:[%s242_s25 + $0x18] sm:$0xff] %v1455_v4  ;;  %v1458_v29 = vpop.f32.mrb[4].mxu1 }
 0x2bc   : > { %v1459_v60 = vadd.f32 %v1458_v29, %v1373_v16  ;;  %v1460_v33 = vpop.f32.mrb[5].mxu1 }
 0x2bd   : > { %v1461_v20 = vadd.f32 %v1460_v33, %v1373_v16 }
 0x2be   : > { %1473 = vst [vmem:[%s242_s25 + $0x20] sm:$0xff] %v1459_v60 }
 0x2bf   : > { %1474 = vst [vmem:[%s242_s25 + $0x28] sm:$0xff] %v1461_v20  ;;  %v1464_v22 = vpop.f32.mrb[6].mxu1 }
 0x2c0   : > { %v1465_v44 = vadd.f32 %v1464_v22, %v1378_v23  ;;  %v1466_v28 = vpop.f32.mrb[7].mxu1 }
 0x2c1   : > { %v1467_v54 = vadd.f32 %v1466_v28, %v1378_v23 }
 0x2c2   : > { %1475 = vst [vmem:[%s242_s25 + $0x30] sm:$0xff] %v1465_v44 }
 0x2c3   : > { %1476 = vst [vmem:[%s242_s25 + $0x38] sm:$0xff] %v1467_v54 }
 0x2c4   : > { %1845 = shalt.err (!%p1842_p5)
}
 0x2c5   : > { %s1846_s14 = scalar_lea.hbm %s2904_s9, 1024  ;;  %s1850_s17 = scalar_lea.hbm %s2961_s5, 2048 }
 0x2c6   : > { %p1847_p6 = scmp.ne.s32.totalorder %s2904_s9, %s1846_s14  ;;  %p1851_p10 = scmp.lt.u32.totalorder %s2904_s9, %s2961_s5 }
 0x2c7   : > { %p1852_p11 = scmp.lt.u32.totalorder %s1850_s17, %s1846_s14  ;;  %p1854_p13 = scmp.lt.u32.totalorder %s1846_s14, %s2904_s9 }
 0x2c8   : > { %p1848_p7 = pnand %p1847_p6, %p1987_p4 }
 0x2c9   : > { %p1853_p12 = por %p1852_p11, %p1851_p10 }
 0x2ca   : > { %p1849_p9 = pneg %p1848_p7 }
 0x2cb   : > { %p1855_p0 = por %p1854_p13, %p1853_p12 }
 0x2cd   : > { %p1856_p1 = pnand %p1855_p0, %p1849_p9 }
 0x2cf   : > { %1859 = shalt.err (!%p1856_p1)
}
 0x2d0   : > { %s1915_s27 = smov 256   ;;  %s1916_s7 = smov 16  }
 0x2d1   : > { %1643 = dma.vmem_to_hbm [thread:$0]  (%p1987_p4), %s2906_s29, 1024, %s2904_s9, %s2910_s21, %s1915_s27, %s1915_s27, %s1916_s7  }
 0x2d2 PF: > { %p1649_p2 = scmp.ge.s32.totalorder %s1910_s23, 2  ;;  %s1508_s8 = sand.u32 1, %s1890_s18  }
 0x2d3   : > { %s1509_s10 = scalar_lea.sflag [#allocation3], %s1508_s8 }
 0x2d4   : > { %p1646_p3 = pnand %p1649_p2, %p1994_p8 }
 0x2d6   : > { %1885 = dma.done.wait (!%p1646_p3), %s1509_s10, 1024  }
 0x2d7   : > { %1887 = vsyncadd (!%p1646_p3), %s1509_s10, 4294966272  ;;  %s18_s23 = sadd.s32 1, %s1910_s23   ;;  %s3081_s18 = smov %s1894_s19 }
 0x2d8   : > { %p15_p5 = scmp.ge.s32.totalorder %s18_s23, 4   ;;  %s3082_s19 = smov %s1898_s20 }
 0x2d9   : > { %s3083_s20 = smov %s2000_s6  ;;  %s3084_s21 = smov %s1906_s22 }
 0x2da   : > { %s3085_s22 = smov %s3087_s26  ;;  %17 = sbr.rel (!%p15_p5) target bundleno = 4 (0x4), region = 75 }
 0x2e1   :  { %1514 = vsyncpa [#allocation3], 1 }
 0x2e2   :  { %1516 = vsyncpa [#allocation3 + $0x1], 1 }

</bundles_post_ra>
